<compile_context>
chip_gen: v7x
topology: tpu7x:2x2x1
jax: 0.10.0
libtpu: 0.0.40
codegen_flags: <defaults>
</compile_context>

<pallas_src>
import functools
import math

import jax
import jax.numpy as jnp
from jax.experimental import pallas as pl
from jax.experimental.pallas import tpu as pltpu

# ---------------- config (stand-in for __C) ----------------
HIDDEN_SIZE = 32
MULTI_HEAD = 4
HIDDEN_SIZE_HEAD = HIDDEN_SIZE // MULTI_HEAD
FF_SIZE = 4 * HIDDEN_SIZE
LN_EPS = 1e-6

# batch block: per-batch VMEM footprint is a few KiB, cap sized for v7x's 64 MiB VMEM.
MAX_BATCH_BLOCK = 64

# --- bf16 weight-slab column layout (all fan-in-32 weights, concatenated on lanes) ---
_W_QKV1 = (0, 96)      # mhatt1 packed [Wq|Wk|Wv]   (32, 96)
_W_M1 = (96, 128)      # mhatt1 merge               (32, 32)
_W_QKV2 = (128, 224)   # mhatt2 packed [Wq|Wk|Wv]   (32, 96)
_W_M2 = (224, 256)     # mhatt2 merge               (32, 32)
_W_FA = (256, 288)     # FCD weight, x half         (32, 32)
_W_FB = (288, 320)     # FCD weight, attend half    (32, 32)
_W_FF1 = (320, 448)    # FFN W1                     (32, 128)
_W_SLAB_COLS = 448

# --- f32 bias/LN slab row layout (each row padded to 128 lanes) ---
(_B_QKV1, _B_M1, _B_QKV2, _B_M2, _B_FCD,
 _B_FF1, _B_FF2, _B_G1, _B_B1, _B_G2, _B_B2, _B_G3, _B_B3) = range(13)
_B_SLAB_ROWS = 13


# ---------------- the fused Pallas kernel ----------------
def fma_kernel(x_ref, y_ref, xb_ref, yb_ref, w_ref, w2_ref, b_ref, o_ref,
               *, n_head, d_head, eps, bblk, sx, sy):
    H = n_head * d_head
    scale = 1.0 / math.sqrt(d_head)

    def wcols(c):                          # static lane-slice of the bf16 weight slab
        return w_ref[:, c[0]:c[1]]

    def brow(r, n):                        # static row-slice of the f32 bias/LN slab
        return b_ref[r:r + 1, 0:n]         # (1, n), broadcasts over rows

    def mm(a, b):
        # bf16 MXU operands (b already bf16 from the slab), f32 accumulation.
        return jnp.dot(a.astype(jnp.bfloat16), b, preferred_element_type=jnp.float32)

    def layer_norm(h, g, b):
        # MCAN LayerNorm: g * (h - mean) / (std + eps) + b, unbiased (N-1) std.
        mean = jnp.mean(h, axis=-1, keepdims=True)
        c = h - mean
        var = jnp.sum(c * c, axis=-1, keepdims=True) * (1.0 / (H - 1))
        # exact reciprocal here (review correctness note); approx only in softmax.
        return g * (c * (1.0 / (jnp.sqrt(var) + eps))) + b

    def mhatt(q_rows, kv_rows, bias, wqkv_c, bqkv_r, wm_c, bm_r, sq, sk, self_attn):
        wqkv = wcols(wqkv_c)               # (32, 96) bf16
        bqkv = brow(bqkv_r, 3 * H)         # (1, 96)  f32
        if self_attn:
            qkv = (mm(q_rows, wqkv) + bqkv).astype(jnp.bfloat16)     # (Bblk*S, 3H)
            q = qkv[:, 0:H].reshape(bblk, sq, H)
            k = qkv[:, H:2 * H].reshape(bblk, sk, H)
            v = qkv[:, 2 * H:3 * H].reshape(bblk, sk, H)
        else:
            q = (mm(q_rows, wqkv[:, 0:H]) + bqkv[:, 0:H]).astype(jnp.bfloat16)
            q = q.reshape(bblk, sq, H)
            kv = (mm(kv_rows, wqkv[:, H:3 * H]) + bqkv[:, H:3 * H]).astype(jnp.bfloat16)
            k = kv[:, 0:H].reshape(bblk, sk, H)
            v = kv[:, H:2 * H].reshape(bblk, sk, H)

        # additive mask bias, hoisted (broadcast issued once, not per head)
        bias_b = jnp.broadcast_to(bias, (bblk, sq, sk))

        heads = []
        for hh in range(n_head):                       # 4 heads, unrolled
            sl = slice(hh * d_head, (hh + 1) * d_head)
            s = jnp.einsum("bqd,bkd->bqk", q[:, :, sl], k[:, :, sl],
                           preferred_element_type=jnp.float32) * scale
            s = s + bias_b
            s = s - jnp.max(s, axis=-1, keepdims=True)
            e = jnp.exp(s)
            p = e * pl.reciprocal(jnp.sum(e, axis=-1, keepdims=True), approx=True)
            heads.append(jnp.einsum("bqk,bkd->bqd", p.astype(jnp.bfloat16), v[:, :, sl],
                                    preferred_element_type=jnp.float32))
        # lane-concat heads, single merge matmul (no per-head accumulate)
        att = jnp.concatenate(heads, axis=-1).reshape(bblk * sq, H)
        return mm(att, wcols(wm_c)) + brow(bm_r, H)

    def fcd_gate(rows, att_rows):
        # sigmoid([rows, att] @ Wf + bf) without materializing the concat
        z = mm(rows, wcols(_W_FA)) + mm(att_rows, wcols(_W_FB)) + brow(_B_FCD, H)
        return jax.nn.sigmoid(z)

    # flatten (Bblk, S, H) -> (Bblk*S, H) once; all row-wise math runs on big-M tiles
    xf = x_ref[...].reshape(bblk * sx, H)
    yf = y_ref[...].reshape(bblk * sy, H)
    xbias = xb_ref[...]                    # (Bblk, 1, Sx)  additive -1e9 mask bias
    ybias = yb_ref[...]                    # (Bblk, 1, Sy)

    # ---- stage 1: self-attention on x ----
    x_sa = mhatt(xf, xf, xbias, _W_QKV1, _B_QKV1, _W_M1, _B_M1, sx, sx, True)
    xc = layer_norm(xf + fcd_gate(xf, x_sa) * x_sa, brow(_B_G1, H), brow(_B_B1, H))

    # ---- stage 2: guided attention (K/V from y) ----
    x_ga = mhatt(xc, yf, ybias, _W_QKV2, _B_QKV2, _W_M2, _B_M2, sx, sy, False)
    xc = layer_norm(xc + fcd_gate(xc, x_ga) * x_ga, brow(_B_G2, H), brow(_B_B2, H))

    # ---- stage 3: fused FFN ----
    hid = jnp.maximum(mm(xc, wcols(_W_FF1)) + brow(_B_FF1, FF_SIZE), 0.0)
    ff = mm(hid, w2_ref[...]) + brow(_B_FF2, H)
    xc = layer_norm(xc + ff, brow(_B_G3, H), brow(_B_B3, H))

    o_ref[...] = xc.reshape(bblk, sx, H)


# ---------------- parameter packing (one-time) ----------------
def pack_fma_params(p):
    """Pack the 21 tensors into: bf16 (32,448) weight slab, bf16 (128,32) W2, f32 (13,128) bias slab."""
    H = HIDDEN_SIZE

    def qkv_w(m):
        return jnp.concatenate([m["wq"], m["wk"], m["wv"]], axis=1)

    w_slab = jnp.concatenate(
        [qkv_w(p["mhatt1"]), p["mhatt1"]["wm"],
         qkv_w(p["mhatt2"]), p["mhatt2"]["wm"],
         p["fcd"]["w"][:H], p["fcd"]["w"][H:],
         p["ffn"]["w1"]],
        axis=1).astype(jnp.bfloat16)
    assert w_slab.shape == (H, _W_SLAB_COLS)

    def row(v):
        v = jnp.asarray(v, jnp.float32).reshape(1, -1)
        return jnp.pad(v, ((0, 0), (0, 128 - v.shape[1])))

    b_slab = jnp.concatenate(
        [row(jnp.concatenate([p["mhatt1"]["bq"], p["mhatt1"]["bk"], p["mhatt1"]["bv"]])),
         row(p["mhatt1"]["bm"]),
         row(jnp.concatenate([p["mhatt2"]["bq"], p["mhatt2"]["bk"], p["mhatt2"]["bv"]])),
         row(p["mhatt2"]["bm"]),
         row(p["fcd"]["b"]),
         row(p["ffn"]["b1"]),
         row(p["ffn"]["b2"]),
         row(p["norm1"]["g"]), row(p["norm1"]["b"]),
         row(p["norm2"]["g"]), row(p["norm2"]["b"]),
         row(p["norm3"]["g"]), row(p["norm3"]["b"])],
        axis=0)
    assert b_slab.shape == (_B_SLAB_ROWS, 128)

    return dict(w_slab=w_slab, w2=p["ffn"]["w2"].astype(jnp.bfloat16), b_slab=b_slab)


# ---------------- wrapper ----------------
@jax.jit
def fma_forward(packed, x, y, x_mask, y_mask):
    B, Sx, H = x.shape
    Sy = y.shape[1]

    # masks -> additive f32 bias (B, 1, S): 1.0 == masked position == -1e9 bias.
    xbias = x_mask.reshape(B, 1, Sx).astype(jnp.float32) * -1e9
    ybias = y_mask.reshape(B, 1, Sy).astype(jnp.float32) * -1e9

    bblk = min(B, MAX_BATCH_BLOCK)
    nblk = pl.cdiv(B, bblk)
    Bp = nblk * bblk
    if Bp != B:                                    # pad batch to a whole block
        pad = ((0, Bp - B), (0, 0), (0, 0))
        x, y, xbias, ybias = [jnp.pad(a, pad) for a in (x, y, xbias, ybias)]

    kernel = functools.partial(fma_kernel, n_head=MULTI_HEAD, d_head=HIDDEN_SIZE_HEAD,
                               eps=LN_EPS, bblk=bblk, sx=Sx, sy=Sy)

    def full(a):
        return pl.BlockSpec(a.shape, lambda i: (0,) * a.ndim)

    out = pl.pallas_call(
        kernel,
        out_shape=jax.ShapeDtypeStruct((Bp, Sx, H), jnp.float32),
        grid=(nblk,),
        in_specs=[pl.BlockSpec((bblk, Sx, H), lambda i: (i, 0, 0)),
                  pl.BlockSpec((bblk, Sy, H), lambda i: (i, 0, 0)),
                  pl.BlockSpec((bblk, 1, Sx), lambda i: (i, 0, 0)),
                  pl.BlockSpec((bblk, 1, Sy), lambda i: (i, 0, 0)),
                  full(packed["w_slab"]), full(packed["w2"]), full(packed["b_slab"])],
        out_specs=pl.BlockSpec((bblk, Sx, H), lambda i: (i, 0, 0)),
        # TODO(synk): on v7x with >=2 batch blocks, switch this axis to
        # pltpu.CORE_PARALLEL to shard batch blocks across the 2 TensorCores.
        compiler_params=pltpu.CompilerParams(dimension_semantics=("parallel",)),
    )(x, y, xbias, ybias, packed["w_slab"], packed["w2"], packed["b_slab"])
    return out[:B]


# ---------------- pure-JAX reference (f32, matches the torch module) ----------------
def _ref_linear(x, w, b, act=None):
    y = x @ w + b
    if act == "relu":
        y = jnp.maximum(y, 0.0)
    elif act == "sigmoid":
        y = jax.nn.sigmoid(y)
    return y


def _ref_ln(h, g, b):
    mean = jnp.mean(h, axis=-1, keepdims=True)
    c = h - mean
    std = jnp.sqrt(jnp.sum(c * c, axis=-1, keepdims=True) / (h.shape[-1] - 1))
    return g * c / (std + LN_EPS) + b


def _ref_mhatt(p, v_in, k_in, q_in, mask):
    B, Sq, H = q_in.shape
    Sk = k_in.shape[1]
    v = _ref_linear(v_in, p["wv"], p["bv"]).reshape(B, Sk, MULTI_HEAD, HIDDEN_SIZE_HEAD).transpose(0, 2, 1, 3)
    k = _ref_linear(k_in, p["wk"], p["bk"]).reshape(B, Sk, MULTI_HEAD, HIDDEN_SIZE_HEAD).transpose(0, 2, 1, 3)
    q = _ref_linear(q_in, p["wq"], p["bq"]).reshape(B, Sq, MULTI_HEAD, HIDDEN_SIZE_HEAD).transpose(0, 2, 1, 3)
    s = jnp.einsum("bhqd,bhkd->bhqk", q, k) / math.sqrt(HIDDEN_SIZE_HEAD)
    s = jnp.where(mask > 0.5, -1e9, s)
    p_att = jax.nn.softmax(s, axis=-1)
    o = jnp.einsum("bhqk,bhkd->bhqd", p_att, v).transpose(0, 2, 1, 3).reshape(B, Sq, H)
    return _ref_linear(o, p["wm"], p["bm"])


def fma_reference(params, x, y, x_mask, y_mask):
    x_SA = _ref_mhatt(params["mhatt1"], x, x, x, x_mask)
    g1 = _ref_linear(jnp.concatenate([x, x_SA], -1), params["fcd"]["w"], params["fcd"]["b"], "sigmoid")
    x = _ref_ln(x + g1 * x_SA, params["norm1"]["g"], params["norm1"]["b"])
    x_GA = _ref_mhatt(params["mhatt2"], y, y, x, y_mask)
    g2 = _ref_linear(jnp.concatenate([x, x_GA], -1), params["fcd"]["w"], params["fcd"]["b"], "sigmoid")
    x = _ref_ln(x + g2 * x_GA, params["norm2"]["g"], params["norm2"]["b"])
    ff = _ref_linear(_ref_linear(x, params["ffn"]["w1"], params["ffn"]["b1"], "relu"),
                     params["ffn"]["w2"], params["ffn"]["b2"])
    return _ref_ln(x + ff, params["norm3"]["g"], params["norm3"]["b"])


# ---------------- deterministic parameter init ----------------
def _init_linear(key, fan_in, fan_out):
    kw, kb = jax.random.split(key)
    bound = 1.0 / math.sqrt(fan_in)
    w = jax.random.uniform(kw, (fan_in, fan_out), jnp.float32, -bound, bound)
    b = jax.random.uniform(kb, (fan_out,), jnp.float32, -bound, bound)
    return w, b


def init_params(key):
    keys = jax.random.split(key, 11)

    def mhatt_p(k):
        k0, k1, k2, k3 = jax.random.split(k, 4)
        wv, bv = _init_linear(k0, HIDDEN_SIZE, HIDDEN_SIZE)
        wk, bk = _init_linear(k1, HIDDEN_SIZE, HIDDEN_SIZE)
        wq, bq = _init_linear(k2, HIDDEN_SIZE, HIDDEN_SIZE)
        wm, bm = _init_linear(k3, HIDDEN_SIZE, HIDDEN_SIZE)
        return dict(wv=wv, bv=bv, wk=wk, bk=bk, wq=wq, bq=bq, wm=wm, bm=bm)

    w1, b1 = _init_linear(keys[2], HIDDEN_SIZE, FF_SIZE)
    w2, b2 = _init_linear(keys[3], FF_SIZE, HIDDEN_SIZE)
    wf, bf = _init_linear(keys[4], 2 * HIDDEN_SIZE, HIDDEN_SIZE)
    ln = lambda: dict(g=jnp.ones((HIDDEN_SIZE,), jnp.float32),
                      b=jnp.zeros((HIDDEN_SIZE,), jnp.float32))
    return dict(
        mhatt1=mhatt_p(keys[0]), mhatt2=mhatt_p(keys[1]),
        ffn=dict(w1=w1, b1=b1, w2=w2, b2=b2),
        fcd=dict(w=wf, b=bf),
        norm1=ln(), norm2=ln(), norm3=ln(),
    )


# ---------------- main ----------------
if __name__ == "__main__":
    key = jax.random.PRNGKey(0)
    kp, kx, ky = jax.random.split(key, 3)

    B, Sx, Sy = 2, 8, 16
    params = init_params(kp)
    packed = pack_fma_params(params)
    x = jax.random.normal(kx, (B, Sx, HIDDEN_SIZE), jnp.float32)
    y = jax.random.normal(ky, (B, Sy, HIDDEN_SIZE), jnp.float32)

    # masks: 1.0 == masked (padding) position, like torch masked_fill(mask, -1e9)
    x_mask = jnp.zeros((B, 1, 1, Sx), jnp.float32).at[1, :, :, -2:].set(1.0)
    y_mask = jnp.zeros((B, 1, 1, Sy), jnp.float32).at[0, :, :, -4:].set(1.0)

    out = jax.block_until_ready(fma_forward(packed, x, y, x_mask, y_mask))

    ref = fma_reference(params, x, y, x_mask, y_mask)
    assert out.shape == (B, Sx, HIDDEN_SIZE)
    # bf16 MXU operands (f32 accumulation) -> widened tolerance vs f32-only.
    max_err = float(jnp.max(jnp.abs(out - ref)))
    assert jnp.allclose(out, ref, rtol=2e-2, atol=2e-2), max_err

    print("KERNEL_OK")
</pallas_src>

<mosaic_0001>
module attributes {stable_mosaic.version = 11 : i64} {
  func.func @fma_kernel(%arg0: i32, %arg1: memref<2x8x32xf32, #tpu.memory_space<vmem>>, %arg2: memref<2x16x32xf32, #tpu.memory_space<vmem>>, %arg3: memref<2x1x8xf32, #tpu.memory_space<vmem>>, %arg4: memref<2x1x16xf32, #tpu.memory_space<vmem>>, %arg5: memref<32x448xbf16, #tpu.memory_space<vmem>>, %arg6: memref<128x32xbf16, #tpu.memory_space<vmem>>, %arg7: memref<13x128xf32, #tpu.memory_space<vmem>>, %arg8: memref<2x8x32xf32, #tpu.memory_space<vmem>>) attributes {dimension_semantics = [#tpu.dimension_semantics<parallel>], iteration_bounds = array<i64: 1>, scalar_prefetch = 0 : i64, scratch_operands = 0 : i64, tpu.core_type = #tpu.core_type<tc>, window_params = [{transform_indices = @transform_0, window_bounds = array<i64: 2, 8, 32>}, {transform_indices = @transform_1, window_bounds = array<i64: 2, 16, 32>}, {transform_indices = @transform_2, window_bounds = array<i64: 2, 1, 8>}, {transform_indices = @transform_3, window_bounds = array<i64: 2, 1, 16>}, {pipeline_mode = #tpu.pipeline_mode<synchronous>, transform_indices = @transform_4, window_bounds = array<i64: 32, 448>}, {pipeline_mode = #tpu.pipeline_mode<synchronous>, transform_indices = @transform_5, window_bounds = array<i64: 128, 32>}, {pipeline_mode = #tpu.pipeline_mode<synchronous>, transform_indices = @transform_6, window_bounds = array<i64: 13, 128>}, {transform_indices = @transform_7, window_bounds = array<i64: 2, 8, 32>}]} {
    %c0 = arith.constant 0 : index
    %c0_0 = arith.constant 0 : index
    %c0_1 = arith.constant 0 : index
    %0 = vector.load %arg1[%c0, %c0_0, %c0_1] : memref<2x8x32xf32, #tpu.memory_space<vmem>>, vector<2x8x32xf32>
    %1 = vector.shape_cast %0 : vector<2x8x32xf32> to vector<16x32xf32>
    %c0_2 = arith.constant 0 : index
    %c0_3 = arith.constant 0 : index
    %c0_4 = arith.constant 0 : index
    %2 = vector.load %arg2[%c0_2, %c0_3, %c0_4] : memref<2x16x32xf32, #tpu.memory_space<vmem>>, vector<2x16x32xf32>
    %3 = vector.shape_cast %2 : vector<2x16x32xf32> to vector<32x32xf32>
    %c0_5 = arith.constant 0 : index
    %c0_6 = arith.constant 0 : index
    %c0_7 = arith.constant 0 : index
    %4 = vector.load %arg3[%c0_5, %c0_6, %c0_7] : memref<2x1x8xf32, #tpu.memory_space<vmem>>, vector<2x1x8xf32>
    %c0_8 = arith.constant 0 : index
    %c0_9 = arith.constant 0 : index
    %c0_10 = arith.constant 0 : index
    %5 = vector.load %arg4[%c0_8, %c0_9, %c0_10] : memref<2x1x16xf32, #tpu.memory_space<vmem>>, vector<2x1x16xf32>
    %c0_11 = arith.constant 0 : index
    %c0_12 = arith.constant 0 : index
    %6 = vector.load %arg5[%c0_11, %c0_12] : memref<32x448xbf16, #tpu.memory_space<vmem>>, vector<32x96xbf16>
    %c0_13 = arith.constant 0 : index
    %c0_14 = arith.constant 0 : index
    %7 = vector.load %arg7[%c0_13, %c0_14] : memref<13x128xf32, #tpu.memory_space<vmem>>, vector<1x96xf32>
    %8 = arith.truncf %1 : vector<16x32xf32> to vector<16x32xbf16>
    %cst = arith.constant dense<0.000000e+00> : vector<16x96xf32>
    %9 = tpu.matmul %8, %6, %cst {dimension_numbers = #tpu.dot_dimension_numbers<[1], [0], [0], [1], [0, 0, 1, 1], [], []>} : vector<16x32xbf16>, vector<32x96xbf16>, vector<16x96xf32> -> vector<16x96xf32>
    %10 = vector.broadcast %7 : vector<1x96xf32> to vector<16x96xf32>
    %11 = arith.addf %9, %10 : vector<16x96xf32>
    %12 = arith.truncf %11 : vector<16x96xf32> to vector<16x96xbf16>
    %13 = vector.extract_strided_slice %12 {offsets = [0, 0], sizes = [16, 32], strides = [1, 1]} : vector<16x96xbf16> to vector<16x32xbf16>
    %14 = vector.shape_cast %13 : vector<16x32xbf16> to vector<2x8x32xbf16>
    %15 = vector.extract_strided_slice %12 {offsets = [0, 32], sizes = [16, 32], strides = [1, 1]} : vector<16x96xbf16> to vector<16x32xbf16>
    %16 = vector.shape_cast %15 : vector<16x32xbf16> to vector<2x8x32xbf16>
    %17 = vector.extract_strided_slice %12 {offsets = [0, 64], sizes = [16, 32], strides = [1, 1]} : vector<16x96xbf16> to vector<16x32xbf16>
    %18 = vector.shape_cast %17 : vector<16x32xbf16> to vector<2x8x32xbf16>
    %19 = vector.shape_cast %4 : vector<2x1x8xf32> to vector<2x1x8xf32>
    %20 = vector.broadcast %19 : vector<2x1x8xf32> to vector<2x8x8xf32>
    %21 = vector.extract_strided_slice %14 {offsets = [0, 0, 0], sizes = [2, 8, 8], strides = [1, 1, 1]} : vector<2x8x32xbf16> to vector<2x8x8xbf16>
    %22 = vector.extract_strided_slice %16 {offsets = [0, 0, 0], sizes = [2, 8, 8], strides = [1, 1, 1]} : vector<2x8x32xbf16> to vector<2x8x8xbf16>
    "tpu.trace_start"() <{level = 10 : i32, message = "bqd,bkd->bqk"}> : () -> ()
    %cst_15 = arith.constant dense<0.000000e+00> : vector<2x8x8xf32>
    %23 = tpu.matmul %21, %22, %cst_15 {dimension_numbers = #tpu.dot_dimension_numbers<[2], [2], [1], [1], [0, 0, 0, 1, 1, 1], [0], [0]>} : vector<2x8x8xbf16>, vector<2x8x8xbf16>, vector<2x8x8xf32> -> vector<2x8x8xf32>
    "tpu.trace_stop"() : () -> ()
    %cst_16 = arith.constant 0.353553385 : f32
    %24 = vector.broadcast %cst_16 : f32 to vector<2x8x8xf32>
    %25 = arith.mulf %23, %24 : vector<2x8x8xf32>
    %26 = arith.addf %25, %20 : vector<2x8x8xf32>
    %cst_17 = arith.constant dense<0xFF800000> : vector<2x8xf32>
    %27 = vector.multi_reduction <maximumf>, %26, %cst_17 [2] : vector<2x8x8xf32> to vector<2x8xf32>
    %28 = vector.shape_cast %27 : vector<2x8xf32> to vector<2x8x1xf32>
    %29 = vector.broadcast %28 : vector<2x8x1xf32> to vector<2x8x8xf32>
    %30 = arith.subf %26, %29 : vector<2x8x8xf32>
    %31 = math.exp %30 : vector<2x8x8xf32>
    %cst_18 = arith.constant dense<0.000000e+00> : vector<2x8xf32>
    %32 = vector.multi_reduction <add>, %31, %cst_18 [2] : vector<2x8x8xf32> to vector<2x8xf32>
    %33 = vector.shape_cast %32 : vector<2x8xf32> to vector<2x8x1xf32>
    %34 = tpu.reciprocal %33 {approx = true} : vector<2x8x1xf32> -> vector<2x8x1xf32>
    %35 = vector.broadcast %34 : vector<2x8x1xf32> to vector<2x8x8xf32>
    %36 = arith.mulf %31, %35 : vector<2x8x8xf32>
    %37 = arith.truncf %36 : vector<2x8x8xf32> to vector<2x8x8xbf16>
    %38 = vector.extract_strided_slice %18 {offsets = [0, 0, 0], sizes = [2, 8, 8], strides = [1, 1, 1]} : vector<2x8x32xbf16> to vector<2x8x8xbf16>
    "tpu.trace_start"() <{level = 10 : i32, message = "bqk,bkd->bqd"}> : () -> ()
    %cst_19 = arith.constant dense<0.000000e+00> : vector<2x8x8xf32>
    %39 = tpu.matmul %37, %38, %cst_19 {dimension_numbers = #tpu.dot_dimension_numbers<[2], [1], [1], [2], [0, 0, 0, 1, 1, 2], [0], [0]>} : vector<2x8x8xbf16>, vector<2x8x8xbf16>, vector<2x8x8xf32> -> vector<2x8x8xf32>
    "tpu.trace_stop"() : () -> ()
    %40 = vector.extract_strided_slice %14 {offsets = [0, 0, 8], sizes = [2, 8, 8], strides = [1, 1, 1]} : vector<2x8x32xbf16> to vector<2x8x8xbf16>
    %41 = vector.extract_strided_slice %16 {offsets = [0, 0, 8], sizes = [2, 8, 8], strides = [1, 1, 1]} : vector<2x8x32xbf16> to vector<2x8x8xbf16>
    "tpu.trace_start"() <{level = 10 : i32, message = "bqd,bkd->bqk"}> : () -> ()
    %cst_20 = arith.constant dense<0.000000e+00> : vector<2x8x8xf32>
    %42 = tpu.matmul %40, %41, %cst_20 {dimension_numbers = #tpu.dot_dimension_numbers<[2], [2], [1], [1], [0, 0, 0, 1, 1, 1], [0], [0]>} : vector<2x8x8xbf16>, vector<2x8x8xbf16>, vector<2x8x8xf32> -> vector<2x8x8xf32>
    "tpu.trace_stop"() : () -> ()
    %cst_21 = arith.constant 0.353553385 : f32
    %43 = vector.broadcast %cst_21 : f32 to vector<2x8x8xf32>
    %44 = arith.mulf %42, %43 : vector<2x8x8xf32>
    %45 = arith.addf %44, %20 : vector<2x8x8xf32>
    %cst_22 = arith.constant dense<0xFF800000> : vector<2x8xf32>
    %46 = vector.multi_reduction <maximumf>, %45, %cst_22 [2] : vector<2x8x8xf32> to vector<2x8xf32>
    %47 = vector.shape_cast %46 : vector<2x8xf32> to vector<2x8x1xf32>
    %48 = vector.broadcast %47 : vector<2x8x1xf32> to vector<2x8x8xf32>
    %49 = arith.subf %45, %48 : vector<2x8x8xf32>
    %50 = math.exp %49 : vector<2x8x8xf32>
    %cst_23 = arith.constant dense<0.000000e+00> : vector<2x8xf32>
    %51 = vector.multi_reduction <add>, %50, %cst_23 [2] : vector<2x8x8xf32> to vector<2x8xf32>
    %52 = vector.shape_cast %51 : vector<2x8xf32> to vector<2x8x1xf32>
    %53 = tpu.reciprocal %52 {approx = true} : vector<2x8x1xf32> -> vector<2x8x1xf32>
    %54 = vector.broadcast %53 : vector<2x8x1xf32> to vector<2x8x8xf32>
    %55 = arith.mulf %50, %54 : vector<2x8x8xf32>
    %56 = arith.truncf %55 : vector<2x8x8xf32> to vector<2x8x8xbf16>
    %57 = vector.extract_strided_slice %18 {offsets = [0, 0, 8], sizes = [2, 8, 8], strides = [1, 1, 1]} : vector<2x8x32xbf16> to vector<2x8x8xbf16>
    "tpu.trace_start"() <{level = 10 : i32, message = "bqk,bkd->bqd"}> : () -> ()
    %cst_24 = arith.constant dense<0.000000e+00> : vector<2x8x8xf32>
    %58 = tpu.matmul %56, %57, %cst_24 {dimension_numbers = #tpu.dot_dimension_numbers<[2], [1], [1], [2], [0, 0, 0, 1, 1, 2], [0], [0]>} : vector<2x8x8xbf16>, vector<2x8x8xbf16>, vector<2x8x8xf32> -> vector<2x8x8xf32>
    "tpu.trace_stop"() : () -> ()
    %59 = vector.extract_strided_slice %14 {offsets = [0, 0, 16], sizes = [2, 8, 8], strides = [1, 1, 1]} : vector<2x8x32xbf16> to vector<2x8x8xbf16>
    %60 = vector.extract_strided_slice %16 {offsets = [0, 0, 16], sizes = [2, 8, 8], strides = [1, 1, 1]} : vector<2x8x32xbf16> to vector<2x8x8xbf16>
    "tpu.trace_start"() <{level = 10 : i32, message = "bqd,bkd->bqk"}> : () -> ()
    %cst_25 = arith.constant dense<0.000000e+00> : vector<2x8x8xf32>
    %61 = tpu.matmul %59, %60, %cst_25 {dimension_numbers = #tpu.dot_dimension_numbers<[2], [2], [1], [1], [0, 0, 0, 1, 1, 1], [0], [0]>} : vector<2x8x8xbf16>, vector<2x8x8xbf16>, vector<2x8x8xf32> -> vector<2x8x8xf32>
    "tpu.trace_stop"() : () -> ()
    %cst_26 = arith.constant 0.353553385 : f32
    %62 = vector.broadcast %cst_26 : f32 to vector<2x8x8xf32>
    %63 = arith.mulf %61, %62 : vector<2x8x8xf32>
    %64 = arith.addf %63, %20 : vector<2x8x8xf32>
    %cst_27 = arith.constant dense<0xFF800000> : vector<2x8xf32>
    %65 = vector.multi_reduction <maximumf>, %64, %cst_27 [2] : vector<2x8x8xf32> to vector<2x8xf32>
    %66 = vector.shape_cast %65 : vector<2x8xf32> to vector<2x8x1xf32>
    %67 = vector.broadcast %66 : vector<2x8x1xf32> to vector<2x8x8xf32>
    %68 = arith.subf %64, %67 : vector<2x8x8xf32>
    %69 = math.exp %68 : vector<2x8x8xf32>
    %cst_28 = arith.constant dense<0.000000e+00> : vector<2x8xf32>
    %70 = vector.multi_reduction <add>, %69, %cst_28 [2] : vector<2x8x8xf32> to vector<2x8xf32>
    %71 = vector.shape_cast %70 : vector<2x8xf32> to vector<2x8x1xf32>
    %72 = tpu.reciprocal %71 {approx = true} : vector<2x8x1xf32> -> vector<2x8x1xf32>
    %73 = vector.broadcast %72 : vector<2x8x1xf32> to vector<2x8x8xf32>
    %74 = arith.mulf %69, %73 : vector<2x8x8xf32>
    %75 = arith.truncf %74 : vector<2x8x8xf32> to vector<2x8x8xbf16>
    %76 = vector.extract_strided_slice %18 {offsets = [0, 0, 16], sizes = [2, 8, 8], strides = [1, 1, 1]} : vector<2x8x32xbf16> to vector<2x8x8xbf16>
    "tpu.trace_start"() <{level = 10 : i32, message = "bqk,bkd->bqd"}> : () -> ()
    %cst_29 = arith.constant dense<0.000000e+00> : vector<2x8x8xf32>
    %77 = tpu.matmul %75, %76, %cst_29 {dimension_numbers = #tpu.dot_dimension_numbers<[2], [1], [1], [2], [0, 0, 0, 1, 1, 2], [0], [0]>} : vector<2x8x8xbf16>, vector<2x8x8xbf16>, vector<2x8x8xf32> -> vector<2x8x8xf32>
    "tpu.trace_stop"() : () -> ()
    %78 = vector.extract_strided_slice %14 {offsets = [0, 0, 24], sizes = [2, 8, 8], strides = [1, 1, 1]} : vector<2x8x32xbf16> to vector<2x8x8xbf16>
    %79 = vector.extract_strided_slice %16 {offsets = [0, 0, 24], sizes = [2, 8, 8], strides = [1, 1, 1]} : vector<2x8x32xbf16> to vector<2x8x8xbf16>
    "tpu.trace_start"() <{level = 10 : i32, message = "bqd,bkd->bqk"}> : () -> ()
    %cst_30 = arith.constant dense<0.000000e+00> : vector<2x8x8xf32>
    %80 = tpu.matmul %78, %79, %cst_30 {dimension_numbers = #tpu.dot_dimension_numbers<[2], [2], [1], [1], [0, 0, 0, 1, 1, 1], [0], [0]>} : vector<2x8x8xbf16>, vector<2x8x8xbf16>, vector<2x8x8xf32> -> vector<2x8x8xf32>
    "tpu.trace_stop"() : () -> ()
    %cst_31 = arith.constant 0.353553385 : f32
    %81 = vector.broadcast %cst_31 : f32 to vector<2x8x8xf32>
    %82 = arith.mulf %80, %81 : vector<2x8x8xf32>
    %83 = arith.addf %82, %20 : vector<2x8x8xf32>
    %cst_32 = arith.constant dense<0xFF800000> : vector<2x8xf32>
    %84 = vector.multi_reduction <maximumf>, %83, %cst_32 [2] : vector<2x8x8xf32> to vector<2x8xf32>
    %85 = vector.shape_cast %84 : vector<2x8xf32> to vector<2x8x1xf32>
    %86 = vector.broadcast %85 : vector<2x8x1xf32> to vector<2x8x8xf32>
    %87 = arith.subf %83, %86 : vector<2x8x8xf32>
    %88 = math.exp %87 : vector<2x8x8xf32>
    %cst_33 = arith.constant dense<0.000000e+00> : vector<2x8xf32>
    %89 = vector.multi_reduction <add>, %88, %cst_33 [2] : vector<2x8x8xf32> to vector<2x8xf32>
    %90 = vector.shape_cast %89 : vector<2x8xf32> to vector<2x8x1xf32>
    %91 = tpu.reciprocal %90 {approx = true} : vector<2x8x1xf32> -> vector<2x8x1xf32>
    %92 = vector.broadcast %91 : vector<2x8x1xf32> to vector<2x8x8xf32>
    %93 = arith.mulf %88, %92 : vector<2x8x8xf32>
    %94 = arith.truncf %93 : vector<2x8x8xf32> to vector<2x8x8xbf16>
    %95 = vector.extract_strided_slice %18 {offsets = [0, 0, 24], sizes = [2, 8, 8], strides = [1, 1, 1]} : vector<2x8x32xbf16> to vector<2x8x8xbf16>
    "tpu.trace_start"() <{level = 10 : i32, message = "bqk,bkd->bqd"}> : () -> ()
    %cst_34 = arith.constant dense<0.000000e+00> : vector<2x8x8xf32>
    %96 = tpu.matmul %94, %95, %cst_34 {dimension_numbers = #tpu.dot_dimension_numbers<[2], [1], [1], [2], [0, 0, 0, 1, 1, 2], [0], [0]>} : vector<2x8x8xbf16>, vector<2x8x8xbf16>, vector<2x8x8xf32> -> vector<2x8x8xf32>
    "tpu.trace_stop"() : () -> ()
    %97 = tpu.concatenate %39, %58, %77, %96 in 2 : vector<2x8x8xf32>, vector<2x8x8xf32>, vector<2x8x8xf32>, vector<2x8x8xf32> -> vector<2x8x32xf32>
    %98 = vector.shape_cast %97 : vector<2x8x32xf32> to vector<16x32xf32>
    %c0_35 = arith.constant 0 : index
    %c96 = arith.constant 96 : index
    %99 = vector.load %arg5[%c0_35, %c96] : memref<32x448xbf16, #tpu.memory_space<vmem>>, vector<32x32xbf16>
    %100 = arith.truncf %98 : vector<16x32xf32> to vector<16x32xbf16>
    %cst_36 = arith.constant dense<0.000000e+00> : vector<16x32xf32>
    %101 = tpu.matmul %100, %99, %cst_36 {dimension_numbers = #tpu.dot_dimension_numbers<[1], [0], [0], [1], [0, 0, 1, 1], [], []>} : vector<16x32xbf16>, vector<32x32xbf16>, vector<16x32xf32> -> vector<16x32xf32>
    %c1 = arith.constant 1 : index
    %c0_37 = arith.constant 0 : index
    %102 = vector.load %arg7[%c1, %c0_37] : memref<13x128xf32, #tpu.memory_space<vmem>>, vector<1x32xf32>
    %103 = vector.broadcast %102 : vector<1x32xf32> to vector<16x32xf32>
    %104 = arith.addf %101, %103 : vector<16x32xf32>
    %c0_38 = arith.constant 0 : index
    %c256 = arith.constant 256 : index
    %105 = vector.load %arg5[%c0_38, %c256] : memref<32x448xbf16, #tpu.memory_space<vmem>>, vector<32x32xbf16>
    %106 = arith.truncf %1 : vector<16x32xf32> to vector<16x32xbf16>
    %cst_39 = arith.constant dense<0.000000e+00> : vector<16x32xf32>
    %107 = tpu.matmul %106, %105, %cst_39 {dimension_numbers = #tpu.dot_dimension_numbers<[1], [0], [0], [1], [0, 0, 1, 1], [], []>} : vector<16x32xbf16>, vector<32x32xbf16>, vector<16x32xf32> -> vector<16x32xf32>
    %c0_40 = arith.constant 0 : index
    %c288 = arith.constant 288 : index
    %108 = vector.load %arg5[%c0_40, %c288] : memref<32x448xbf16, #tpu.memory_space<vmem>>, vector<32x32xbf16>
    %109 = arith.truncf %104 : vector<16x32xf32> to vector<16x32xbf16>
    %cst_41 = arith.constant dense<0.000000e+00> : vector<16x32xf32>
    %110 = tpu.matmul %109, %108, %cst_41 {dimension_numbers = #tpu.dot_dimension_numbers<[1], [0], [0], [1], [0, 0, 1, 1], [], []>} : vector<16x32xbf16>, vector<32x32xbf16>, vector<16x32xf32> -> vector<16x32xf32>
    %111 = arith.addf %107, %110 : vector<16x32xf32>
    %c4 = arith.constant 4 : index
    %c0_42 = arith.constant 0 : index
    %112 = vector.load %arg7[%c4, %c0_42] : memref<13x128xf32, #tpu.memory_space<vmem>>, vector<1x32xf32>
    %113 = vector.broadcast %112 : vector<1x32xf32> to vector<16x32xf32>
    %114 = arith.addf %111, %113 : vector<16x32xf32>
    %115 = arith.negf %114 : vector<16x32xf32>
    %116 = math.exp %115 : vector<16x32xf32>
    %cst_43 = arith.constant 1.000000e+00 : f32
    %117 = vector.broadcast %cst_43 : f32 to vector<16x32xf32>
    %118 = arith.addf %117, %116 : vector<16x32xf32>
    %119 = arith.divf %117, %118 : vector<16x32xf32>
    %120 = arith.mulf %119, %104 : vector<16x32xf32>
    %121 = arith.addf %1, %120 : vector<16x32xf32>
    %c7 = arith.constant 7 : index
    %c0_44 = arith.constant 0 : index
    %122 = vector.load %arg7[%c7, %c0_44] : memref<13x128xf32, #tpu.memory_space<vmem>>, vector<1x32xf32>
    %c8 = arith.constant 8 : index
    %c0_45 = arith.constant 0 : index
    %123 = vector.load %arg7[%c8, %c0_45] : memref<13x128xf32, #tpu.memory_space<vmem>>, vector<1x32xf32>
    %cst_46 = arith.constant dense<0.000000e+00> : vector<16xf32>
    %124 = vector.multi_reduction <add>, %121, %cst_46 [1] : vector<16x32xf32> to vector<16xf32>
    %125 = vector.shape_cast %124 : vector<16xf32> to vector<16x1xf32>
    %cst_47 = arith.constant 3.200000e+01 : f32
    %126 = vector.broadcast %cst_47 : f32 to vector<16x1xf32>
    %127 = arith.divf %125, %126 : vector<16x1xf32>
    %128 = vector.broadcast %127 : vector<16x1xf32> to vector<16x32xf32>
    %129 = arith.subf %121, %128 : vector<16x32xf32>
    %130 = arith.mulf %129, %129 : vector<16x32xf32>
    %cst_48 = arith.constant dense<0.000000e+00> : vector<16xf32>
    %131 = vector.multi_reduction <add>, %130, %cst_48 [1] : vector<16x32xf32> to vector<16xf32>
    %132 = vector.shape_cast %131 : vector<16xf32> to vector<16x1xf32>
    %cst_49 = arith.constant 0.0322580636 : f32
    %133 = vector.broadcast %cst_49 : f32 to vector<16x1xf32>
    %134 = arith.mulf %132, %133 : vector<16x1xf32>
    %135 = math.sqrt %134 : vector<16x1xf32>
    %cst_50 = arith.constant 9.99999997E-7 : f32
    %136 = vector.broadcast %cst_50 : f32 to vector<16x1xf32>
    %137 = arith.addf %135, %136 : vector<16x1xf32>
    %cst_51 = arith.constant 1.000000e+00 : f32
    %138 = vector.broadcast %cst_51 : f32 to vector<16x1xf32>
    %139 = arith.divf %138, %137 : vector<16x1xf32>
    %140 = vector.broadcast %139 : vector<16x1xf32> to vector<16x32xf32>
    %141 = arith.mulf %129, %140 : vector<16x32xf32>
    %142 = vector.broadcast %122 : vector<1x32xf32> to vector<16x32xf32>
    %143 = arith.mulf %142, %141 : vector<16x32xf32>
    %144 = vector.broadcast %123 : vector<1x32xf32> to vector<16x32xf32>
    %145 = arith.addf %143, %144 : vector<16x32xf32>
    %c0_52 = arith.constant 0 : index
    %c128 = arith.constant 128 : index
    %146 = vector.load %arg5[%c0_52, %c128] : memref<32x448xbf16, #tpu.memory_space<vmem>>, vector<32x96xbf16>
    %c2 = arith.constant 2 : index
    %c0_53 = arith.constant 0 : index
    %147 = vector.load %arg7[%c2, %c0_53] : memref<13x128xf32, #tpu.memory_space<vmem>>, vector<1x96xf32>
    %148 = vector.extract_strided_slice %146 {offsets = [0, 0], sizes = [32, 32], strides = [1, 1]} : vector<32x96xbf16> to vector<32x32xbf16>
    %149 = arith.truncf %145 : vector<16x32xf32> to vector<16x32xbf16>
    %cst_54 = arith.constant dense<0.000000e+00> : vector<16x32xf32>
    %150 = tpu.matmul %149, %148, %cst_54 {dimension_numbers = #tpu.dot_dimension_numbers<[1], [0], [0], [1], [0, 0, 1, 1], [], []>} : vector<16x32xbf16>, vector<32x32xbf16>, vector<16x32xf32> -> vector<16x32xf32>
    %151 = vector.extract_strided_slice %147 {offsets = [0, 0], sizes = [1, 32], strides = [1, 1]} : vector<1x96xf32> to vector<1x32xf32>
    %152 = vector.broadcast %151 : vector<1x32xf32> to vector<16x32xf32>
    %153 = arith.addf %150, %152 : vector<16x32xf32>
    %154 = arith.truncf %153 : vector<16x32xf32> to vector<16x32xbf16>
    %155 = vector.shape_cast %154 : vector<16x32xbf16> to vector<2x8x32xbf16>
    %156 = vector.extract_strided_slice %146 {offsets = [0, 32], sizes = [32, 64], strides = [1, 1]} : vector<32x96xbf16> to vector<32x64xbf16>
    %157 = arith.truncf %3 : vector<32x32xf32> to vector<32x32xbf16>
    %cst_55 = arith.constant dense<0.000000e+00> : vector<32x64xf32>
    %158 = tpu.matmul %157, %156, %cst_55 {dimension_numbers = #tpu.dot_dimension_numbers<[1], [0], [0], [1], [0, 0, 1, 1], [], []>} : vector<32x32xbf16>, vector<32x64xbf16>, vector<32x64xf32> -> vector<32x64xf32>
    %159 = vector.extract_strided_slice %147 {offsets = [0, 32], sizes = [1, 64], strides = [1, 1]} : vector<1x96xf32> to vector<1x64xf32>
    %160 = vector.broadcast %159 : vector<1x64xf32> to vector<32x64xf32>
    %161 = arith.addf %158, %160 : vector<32x64xf32>
    %162 = arith.truncf %161 : vector<32x64xf32> to vector<32x64xbf16>
    %163 = vector.extract_strided_slice %162 {offsets = [0, 0], sizes = [32, 32], strides = [1, 1]} : vector<32x64xbf16> to vector<32x32xbf16>
    %164 = vector.shape_cast %163 : vector<32x32xbf16> to vector<2x16x32xbf16>
    %165 = vector.extract_strided_slice %162 {offsets = [0, 32], sizes = [32, 32], strides = [1, 1]} : vector<32x64xbf16> to vector<32x32xbf16>
    %166 = vector.shape_cast %165 : vector<32x32xbf16> to vector<2x16x32xbf16>
    %167 = vector.shape_cast %5 : vector<2x1x16xf32> to vector<2x1x16xf32>
    %168 = vector.broadcast %167 : vector<2x1x16xf32> to vector<2x8x16xf32>
    %169 = vector.extract_strided_slice %155 {offsets = [0, 0, 0], sizes = [2, 8, 8], strides = [1, 1, 1]} : vector<2x8x32xbf16> to vector<2x8x8xbf16>
    %170 = vector.extract_strided_slice %164 {offsets = [0, 0, 0], sizes = [2, 16, 8], strides = [1, 1, 1]} : vector<2x16x32xbf16> to vector<2x16x8xbf16>
    "tpu.trace_start"() <{level = 10 : i32, message = "bqd,bkd->bqk"}> : () -> ()
    %cst_56 = arith.constant dense<0.000000e+00> : vector<2x8x16xf32>
    %171 = tpu.matmul %169, %170, %cst_56 {dimension_numbers = #tpu.dot_dimension_numbers<[2], [2], [1], [1], [0, 0, 0, 1, 1, 1], [0], [0]>} : vector<2x8x8xbf16>, vector<2x16x8xbf16>, vector<2x8x16xf32> -> vector<2x8x16xf32>
    "tpu.trace_stop"() : () -> ()
    %cst_57 = arith.constant 0.353553385 : f32
    %172 = vector.broadcast %cst_57 : f32 to vector<2x8x16xf32>
    %173 = arith.mulf %171, %172 : vector<2x8x16xf32>
    %174 = arith.addf %173, %168 : vector<2x8x16xf32>
    %cst_58 = arith.constant dense<0xFF800000> : vector<2x8xf32>
    %175 = vector.multi_reduction <maximumf>, %174, %cst_58 [2] : vector<2x8x16xf32> to vector<2x8xf32>
    %176 = vector.shape_cast %175 : vector<2x8xf32> to vector<2x8x1xf32>
    %177 = vector.broadcast %176 : vector<2x8x1xf32> to vector<2x8x16xf32>
    %178 = arith.subf %174, %177 : vector<2x8x16xf32>
    %179 = math.exp %178 : vector<2x8x16xf32>
    %cst_59 = arith.constant dense<0.000000e+00> : vector<2x8xf32>
    %180 = vector.multi_reduction <add>, %179, %cst_59 [2] : vector<2x8x16xf32> to vector<2x8xf32>
    %181 = vector.shape_cast %180 : vector<2x8xf32> to vector<2x8x1xf32>
    %182 = tpu.reciprocal %181 {approx = true} : vector<2x8x1xf32> -> vector<2x8x1xf32>
    %183 = vector.broadcast %182 : vector<2x8x1xf32> to vector<2x8x16xf32>
    %184 = arith.mulf %179, %183 : vector<2x8x16xf32>
    %185 = arith.truncf %184 : vector<2x8x16xf32> to vector<2x8x16xbf16>
    %186 = vector.extract_strided_slice %166 {offsets = [0, 0, 0], sizes = [2, 16, 8], strides = [1, 1, 1]} : vector<2x16x32xbf16> to vector<2x16x8xbf16>
    "tpu.trace_start"() <{level = 10 : i32, message = "bqk,bkd->bqd"}> : () -> ()
    %cst_60 = arith.constant dense<0.000000e+00> : vector<2x8x8xf32>
    %187 = tpu.matmul %185, %186, %cst_60 {dimension_numbers = #tpu.dot_dimension_numbers<[2], [1], [1], [2], [0, 0, 0, 1, 1, 2], [0], [0]>} : vector<2x8x16xbf16>, vector<2x16x8xbf16>, vector<2x8x8xf32> -> vector<2x8x8xf32>
    "tpu.trace_stop"() : () -> ()
    %188 = vector.extract_strided_slice %155 {offsets = [0, 0, 8], sizes = [2, 8, 8], strides = [1, 1, 1]} : vector<2x8x32xbf16> to vector<2x8x8xbf16>
    %189 = vector.extract_strided_slice %164 {offsets = [0, 0, 8], sizes = [2, 16, 8], strides = [1, 1, 1]} : vector<2x16x32xbf16> to vector<2x16x8xbf16>
    "tpu.trace_start"() <{level = 10 : i32, message = "bqd,bkd->bqk"}> : () -> ()
    %cst_61 = arith.constant dense<0.000000e+00> : vector<2x8x16xf32>
    %190 = tpu.matmul %188, %189, %cst_61 {dimension_numbers = #tpu.dot_dimension_numbers<[2], [2], [1], [1], [0, 0, 0, 1, 1, 1], [0], [0]>} : vector<2x8x8xbf16>, vector<2x16x8xbf16>, vector<2x8x16xf32> -> vector<2x8x16xf32>
    "tpu.trace_stop"() : () -> ()
    %cst_62 = arith.constant 0.353553385 : f32
    %191 = vector.broadcast %cst_62 : f32 to vector<2x8x16xf32>
    %192 = arith.mulf %190, %191 : vector<2x8x16xf32>
    %193 = arith.addf %192, %168 : vector<2x8x16xf32>
    %cst_63 = arith.constant dense<0xFF800000> : vector<2x8xf32>
    %194 = vector.multi_reduction <maximumf>, %193, %cst_63 [2] : vector<2x8x16xf32> to vector<2x8xf32>
    %195 = vector.shape_cast %194 : vector<2x8xf32> to vector<2x8x1xf32>
    %196 = vector.broadcast %195 : vector<2x8x1xf32> to vector<2x8x16xf32>
    %197 = arith.subf %193, %196 : vector<2x8x16xf32>
    %198 = math.exp %197 : vector<2x8x16xf32>
    %cst_64 = arith.constant dense<0.000000e+00> : vector<2x8xf32>
    %199 = vector.multi_reduction <add>, %198, %cst_64 [2] : vector<2x8x16xf32> to vector<2x8xf32>
    %200 = vector.shape_cast %199 : vector<2x8xf32> to vector<2x8x1xf32>
    %201 = tpu.reciprocal %200 {approx = true} : vector<2x8x1xf32> -> vector<2x8x1xf32>
    %202 = vector.broadcast %201 : vector<2x8x1xf32> to vector<2x8x16xf32>
    %203 = arith.mulf %198, %202 : vector<2x8x16xf32>
    %204 = arith.truncf %203 : vector<2x8x16xf32> to vector<2x8x16xbf16>
    %205 = vector.extract_strided_slice %166 {offsets = [0, 0, 8], sizes = [2, 16, 8], strides = [1, 1, 1]} : vector<2x16x32xbf16> to vector<2x16x8xbf16>
    "tpu.trace_start"() <{level = 10 : i32, message = "bqk,bkd->bqd"}> : () -> ()
    %cst_65 = arith.constant dense<0.000000e+00> : vector<2x8x8xf32>
    %206 = tpu.matmul %204, %205, %cst_65 {dimension_numbers = #tpu.dot_dimension_numbers<[2], [1], [1], [2], [0, 0, 0, 1, 1, 2], [0], [0]>} : vector<2x8x16xbf16>, vector<2x16x8xbf16>, vector<2x8x8xf32> -> vector<2x8x8xf32>
    "tpu.trace_stop"() : () -> ()
    %207 = vector.extract_strided_slice %155 {offsets = [0, 0, 16], sizes = [2, 8, 8], strides = [1, 1, 1]} : vector<2x8x32xbf16> to vector<2x8x8xbf16>
    %208 = vector.extract_strided_slice %164 {offsets = [0, 0, 16], sizes = [2, 16, 8], strides = [1, 1, 1]} : vector<2x16x32xbf16> to vector<2x16x8xbf16>
    "tpu.trace_start"() <{level = 10 : i32, message = "bqd,bkd->bqk"}> : () -> ()
    %cst_66 = arith.constant dense<0.000000e+00> : vector<2x8x16xf32>
    %209 = tpu.matmul %207, %208, %cst_66 {dimension_numbers = #tpu.dot_dimension_numbers<[2], [2], [1], [1], [0, 0, 0, 1, 1, 1], [0], [0]>} : vector<2x8x8xbf16>, vector<2x16x8xbf16>, vector<2x8x16xf32> -> vector<2x8x16xf32>
    "tpu.trace_stop"() : () -> ()
    %cst_67 = arith.constant 0.353553385 : f32
    %210 = vector.broadcast %cst_67 : f32 to vector<2x8x16xf32>
    %211 = arith.mulf %209, %210 : vector<2x8x16xf32>
    %212 = arith.addf %211, %168 : vector<2x8x16xf32>
    %cst_68 = arith.constant dense<0xFF800000> : vector<2x8xf32>
    %213 = vector.multi_reduction <maximumf>, %212, %cst_68 [2] : vector<2x8x16xf32> to vector<2x8xf32>
    %214 = vector.shape_cast %213 : vector<2x8xf32> to vector<2x8x1xf32>
    %215 = vector.broadcast %214 : vector<2x8x1xf32> to vector<2x8x16xf32>
    %216 = arith.subf %212, %215 : vector<2x8x16xf32>
    %217 = math.exp %216 : vector<2x8x16xf32>
    %cst_69 = arith.constant dense<0.000000e+00> : vector<2x8xf32>
    %218 = vector.multi_reduction <add>, %217, %cst_69 [2] : vector<2x8x16xf32> to vector<2x8xf32>
    %219 = vector.shape_cast %218 : vector<2x8xf32> to vector<2x8x1xf32>
    %220 = tpu.reciprocal %219 {approx = true} : vector<2x8x1xf32> -> vector<2x8x1xf32>
    %221 = vector.broadcast %220 : vector<2x8x1xf32> to vector<2x8x16xf32>
    %222 = arith.mulf %217, %221 : vector<2x8x16xf32>
    %223 = arith.truncf %222 : vector<2x8x16xf32> to vector<2x8x16xbf16>
    %224 = vector.extract_strided_slice %166 {offsets = [0, 0, 16], sizes = [2, 16, 8], strides = [1, 1, 1]} : vector<2x16x32xbf16> to vector<2x16x8xbf16>
    "tpu.trace_start"() <{level = 10 : i32, message = "bqk,bkd->bqd"}> : () -> ()
    %cst_70 = arith.constant dense<0.000000e+00> : vector<2x8x8xf32>
    %225 = tpu.matmul %223, %224, %cst_70 {dimension_numbers = #tpu.dot_dimension_numbers<[2], [1], [1], [2], [0, 0, 0, 1, 1, 2], [0], [0]>} : vector<2x8x16xbf16>, vector<2x16x8xbf16>, vector<2x8x8xf32> -> vector<2x8x8xf32>
    "tpu.trace_stop"() : () -> ()
    %226 = vector.extract_strided_slice %155 {offsets = [0, 0, 24], sizes = [2, 8, 8], strides = [1, 1, 1]} : vector<2x8x32xbf16> to vector<2x8x8xbf16>
    %227 = vector.extract_strided_slice %164 {offsets = [0, 0, 24], sizes = [2, 16, 8], strides = [1, 1, 1]} : vector<2x16x32xbf16> to vector<2x16x8xbf16>
    "tpu.trace_start"() <{level = 10 : i32, message = "bqd,bkd->bqk"}> : () -> ()
    %cst_71 = arith.constant dense<0.000000e+00> : vector<2x8x16xf32>
    %228 = tpu.matmul %226, %227, %cst_71 {dimension_numbers = #tpu.dot_dimension_numbers<[2], [2], [1], [1], [0, 0, 0, 1, 1, 1], [0], [0]>} : vector<2x8x8xbf16>, vector<2x16x8xbf16>, vector<2x8x16xf32> -> vector<2x8x16xf32>
    "tpu.trace_stop"() : () -> ()
    %cst_72 = arith.constant 0.353553385 : f32
    %229 = vector.broadcast %cst_72 : f32 to vector<2x8x16xf32>
    %230 = arith.mulf %228, %229 : vector<2x8x16xf32>
    %231 = arith.addf %230, %168 : vector<2x8x16xf32>
    %cst_73 = arith.constant dense<0xFF800000> : vector<2x8xf32>
    %232 = vector.multi_reduction <maximumf>, %231, %cst_73 [2] : vector<2x8x16xf32> to vector<2x8xf32>
    %233 = vector.shape_cast %232 : vector<2x8xf32> to vector<2x8x1xf32>
    %234 = vector.broadcast %233 : vector<2x8x1xf32> to vector<2x8x16xf32>
    %235 = arith.subf %231, %234 : vector<2x8x16xf32>
    %236 = math.exp %235 : vector<2x8x16xf32>
    %cst_74 = arith.constant dense<0.000000e+00> : vector<2x8xf32>
    %237 = vector.multi_reduction <add>, %236, %cst_74 [2] : vector<2x8x16xf32> to vector<2x8xf32>
    %238 = vector.shape_cast %237 : vector<2x8xf32> to vector<2x8x1xf32>
    %239 = tpu.reciprocal %238 {approx = true} : vector<2x8x1xf32> -> vector<2x8x1xf32>
    %240 = vector.broadcast %239 : vector<2x8x1xf32> to vector<2x8x16xf32>
    %241 = arith.mulf %236, %240 : vector<2x8x16xf32>
    %242 = arith.truncf %241 : vector<2x8x16xf32> to vector<2x8x16xbf16>
    %243 = vector.extract_strided_slice %166 {offsets = [0, 0, 24], sizes = [2, 16, 8], strides = [1, 1, 1]} : vector<2x16x32xbf16> to vector<2x16x8xbf16>
    "tpu.trace_start"() <{level = 10 : i32, message = "bqk,bkd->bqd"}> : () -> ()
    %cst_75 = arith.constant dense<0.000000e+00> : vector<2x8x8xf32>
    %244 = tpu.matmul %242, %243, %cst_75 {dimension_numbers = #tpu.dot_dimension_numbers<[2], [1], [1], [2], [0, 0, 0, 1, 1, 2], [0], [0]>} : vector<2x8x16xbf16>, vector<2x16x8xbf16>, vector<2x8x8xf32> -> vector<2x8x8xf32>
    "tpu.trace_stop"() : () -> ()
    %245 = tpu.concatenate %187, %206, %225, %244 in 2 : vector<2x8x8xf32>, vector<2x8x8xf32>, vector<2x8x8xf32>, vector<2x8x8xf32> -> vector<2x8x32xf32>
    %246 = vector.shape_cast %245 : vector<2x8x32xf32> to vector<16x32xf32>
    %c0_76 = arith.constant 0 : index
    %c224 = arith.constant 224 : index
    %247 = vector.load %arg5[%c0_76, %c224] : memref<32x448xbf16, #tpu.memory_space<vmem>>, vector<32x32xbf16>
    %248 = arith.truncf %246 : vector<16x32xf32> to vector<16x32xbf16>
    %cst_77 = arith.constant dense<0.000000e+00> : vector<16x32xf32>
    %249 = tpu.matmul %248, %247, %cst_77 {dimension_numbers = #tpu.dot_dimension_numbers<[1], [0], [0], [1], [0, 0, 1, 1], [], []>} : vector<16x32xbf16>, vector<32x32xbf16>, vector<16x32xf32> -> vector<16x32xf32>
    %c3 = arith.constant 3 : index
    %c0_78 = arith.constant 0 : index
    %250 = vector.load %arg7[%c3, %c0_78] : memref<13x128xf32, #tpu.memory_space<vmem>>, vector<1x32xf32>
    %251 = vector.broadcast %250 : vector<1x32xf32> to vector<16x32xf32>
    %252 = arith.addf %249, %251 : vector<16x32xf32>
    %c0_79 = arith.constant 0 : index
    %c256_80 = arith.constant 256 : index
    %253 = vector.load %arg5[%c0_79, %c256_80] : memref<32x448xbf16, #tpu.memory_space<vmem>>, vector<32x32xbf16>
    %254 = arith.truncf %145 : vector<16x32xf32> to vector<16x32xbf16>
    %cst_81 = arith.constant dense<0.000000e+00> : vector<16x32xf32>
    %255 = tpu.matmul %254, %253, %cst_81 {dimension_numbers = #tpu.dot_dimension_numbers<[1], [0], [0], [1], [0, 0, 1, 1], [], []>} : vector<16x32xbf16>, vector<32x32xbf16>, vector<16x32xf32> -> vector<16x32xf32>
    %c0_82 = arith.constant 0 : index
    %c288_83 = arith.constant 288 : index
    %256 = vector.load %arg5[%c0_82, %c288_83] : memref<32x448xbf16, #tpu.memory_space<vmem>>, vector<32x32xbf16>
    %257 = arith.truncf %252 : vector<16x32xf32> to vector<16x32xbf16>
    %cst_84 = arith.constant dense<0.000000e+00> : vector<16x32xf32>
    %258 = tpu.matmul %257, %256, %cst_84 {dimension_numbers = #tpu.dot_dimension_numbers<[1], [0], [0], [1], [0, 0, 1, 1], [], []>} : vector<16x32xbf16>, vector<32x32xbf16>, vector<16x32xf32> -> vector<16x32xf32>
    %259 = arith.addf %255, %258 : vector<16x32xf32>
    %c4_85 = arith.constant 4 : index
    %c0_86 = arith.constant 0 : index
    %260 = vector.load %arg7[%c4_85, %c0_86] : memref<13x128xf32, #tpu.memory_space<vmem>>, vector<1x32xf32>
    %261 = vector.broadcast %260 : vector<1x32xf32> to vector<16x32xf32>
    %262 = arith.addf %259, %261 : vector<16x32xf32>
    %263 = arith.negf %262 : vector<16x32xf32>
    %264 = math.exp %263 : vector<16x32xf32>
    %cst_87 = arith.constant 1.000000e+00 : f32
    %265 = vector.broadcast %cst_87 : f32 to vector<16x32xf32>
    %266 = arith.addf %265, %264 : vector<16x32xf32>
    %267 = arith.divf %265, %266 : vector<16x32xf32>
    %268 = arith.mulf %267, %252 : vector<16x32xf32>
    %269 = arith.addf %145, %268 : vector<16x32xf32>
    %c9 = arith.constant 9 : index
    %c0_88 = arith.constant 0 : index
    %270 = vector.load %arg7[%c9, %c0_88] : memref<13x128xf32, #tpu.memory_space<vmem>>, vector<1x32xf32>
    %c10 = arith.constant 10 : index
    %c0_89 = arith.constant 0 : index
    %271 = vector.load %arg7[%c10, %c0_89] : memref<13x128xf32, #tpu.memory_space<vmem>>, vector<1x32xf32>
    %cst_90 = arith.constant dense<0.000000e+00> : vector<16xf32>
    %272 = vector.multi_reduction <add>, %269, %cst_90 [1] : vector<16x32xf32> to vector<16xf32>
    %273 = vector.shape_cast %272 : vector<16xf32> to vector<16x1xf32>
    %cst_91 = arith.constant 3.200000e+01 : f32
    %274 = vector.broadcast %cst_91 : f32 to vector<16x1xf32>
    %275 = arith.divf %273, %274 : vector<16x1xf32>
    %276 = vector.broadcast %275 : vector<16x1xf32> to vector<16x32xf32>
    %277 = arith.subf %269, %276 : vector<16x32xf32>
    %278 = arith.mulf %277, %277 : vector<16x32xf32>
    %cst_92 = arith.constant dense<0.000000e+00> : vector<16xf32>
    %279 = vector.multi_reduction <add>, %278, %cst_92 [1] : vector<16x32xf32> to vector<16xf32>
    %280 = vector.shape_cast %279 : vector<16xf32> to vector<16x1xf32>
    %cst_93 = arith.constant 0.0322580636 : f32
    %281 = vector.broadcast %cst_93 : f32 to vector<16x1xf32>
    %282 = arith.mulf %280, %281 : vector<16x1xf32>
    %283 = math.sqrt %282 : vector<16x1xf32>
    %cst_94 = arith.constant 9.99999997E-7 : f32
    %284 = vector.broadcast %cst_94 : f32 to vector<16x1xf32>
    %285 = arith.addf %283, %284 : vector<16x1xf32>
    %cst_95 = arith.constant 1.000000e+00 : f32
    %286 = vector.broadcast %cst_95 : f32 to vector<16x1xf32>
    %287 = arith.divf %286, %285 : vector<16x1xf32>
    %288 = vector.broadcast %287 : vector<16x1xf32> to vector<16x32xf32>
    %289 = arith.mulf %277, %288 : vector<16x32xf32>
    %290 = vector.broadcast %270 : vector<1x32xf32> to vector<16x32xf32>
    %291 = arith.mulf %290, %289 : vector<16x32xf32>
    %292 = vector.broadcast %271 : vector<1x32xf32> to vector<16x32xf32>
    %293 = arith.addf %291, %292 : vector<16x32xf32>
    %c0_96 = arith.constant 0 : index
    %c320 = arith.constant 320 : index
    %294 = vector.load %arg5[%c0_96, %c320] : memref<32x448xbf16, #tpu.memory_space<vmem>>, vector<32x128xbf16>
    %295 = arith.truncf %293 : vector<16x32xf32> to vector<16x32xbf16>
    %cst_97 = arith.constant dense<0.000000e+00> : vector<16x128xf32>
    %296 = tpu.matmul %295, %294, %cst_97 {dimension_numbers = #tpu.dot_dimension_numbers<[1], [0], [0], [1], [0, 0, 1, 1], [], []>} : vector<16x32xbf16>, vector<32x128xbf16>, vector<16x128xf32> -> vector<16x128xf32>
    %c5 = arith.constant 5 : index
    %c0_98 = arith.constant 0 : index
    %297 = vector.load %arg7[%c5, %c0_98] : memref<13x128xf32, #tpu.memory_space<vmem>>, vector<1x128xf32>
    %298 = vector.broadcast %297 : vector<1x128xf32> to vector<16x128xf32>
    %299 = arith.addf %296, %298 : vector<16x128xf32>
    %cst_99 = arith.constant 0.000000e+00 : f32
    %300 = vector.broadcast %cst_99 : f32 to vector<16x128xf32>
    %301 = arith.maximumf %299, %300 : vector<16x128xf32>
    %c0_100 = arith.constant 0 : index
    %c0_101 = arith.constant 0 : index
    %302 = vector.load %arg6[%c0_100, %c0_101] : memref<128x32xbf16, #tpu.memory_space<vmem>>, vector<128x32xbf16>
    %303 = arith.truncf %301 : vector<16x128xf32> to vector<16x128xbf16>
    %cst_102 = arith.constant dense<0.000000e+00> : vector<16x32xf32>
    %304 = tpu.matmul %303, %302, %cst_102 {dimension_numbers = #tpu.dot_dimension_numbers<[1], [0], [0], [1], [0, 0, 1, 1], [], []>} : vector<16x128xbf16>, vector<128x32xbf16>, vector<16x32xf32> -> vector<16x32xf32>
    %c6 = arith.constant 6 : index
    %c0_103 = arith.constant 0 : index
    %305 = vector.load %arg7[%c6, %c0_103] : memref<13x128xf32, #tpu.memory_space<vmem>>, vector<1x32xf32>
    %306 = vector.broadcast %305 : vector<1x32xf32> to vector<16x32xf32>
    %307 = arith.addf %304, %306 : vector<16x32xf32>
    %308 = arith.addf %293, %307 : vector<16x32xf32>
    %c11 = arith.constant 11 : index
    %c0_104 = arith.constant 0 : index
    %309 = vector.load %arg7[%c11, %c0_104] : memref<13x128xf32, #tpu.memory_space<vmem>>, vector<1x32xf32>
    %c12 = arith.constant 12 : index
    %c0_105 = arith.constant 0 : index
    %310 = vector.load %arg7[%c12, %c0_105] : memref<13x128xf32, #tpu.memory_space<vmem>>, vector<1x32xf32>
    %cst_106 = arith.constant dense<0.000000e+00> : vector<16xf32>
    %311 = vector.multi_reduction <add>, %308, %cst_106 [1] : vector<16x32xf32> to vector<16xf32>
    %312 = vector.shape_cast %311 : vector<16xf32> to vector<16x1xf32>
    %cst_107 = arith.constant 3.200000e+01 : f32
    %313 = vector.broadcast %cst_107 : f32 to vector<16x1xf32>
    %314 = arith.divf %312, %313 : vector<16x1xf32>
    %315 = vector.broadcast %314 : vector<16x1xf32> to vector<16x32xf32>
    %316 = arith.subf %308, %315 : vector<16x32xf32>
    %317 = arith.mulf %316, %316 : vector<16x32xf32>
    %cst_108 = arith.constant dense<0.000000e+00> : vector<16xf32>
    %318 = vector.multi_reduction <add>, %317, %cst_108 [1] : vector<16x32xf32> to vector<16xf32>
    %319 = vector.shape_cast %318 : vector<16xf32> to vector<16x1xf32>
    %cst_109 = arith.constant 0.0322580636 : f32
    %320 = vector.broadcast %cst_109 : f32 to vector<16x1xf32>
    %321 = arith.mulf %319, %320 : vector<16x1xf32>
    %322 = math.sqrt %321 : vector<16x1xf32>
    %cst_110 = arith.constant 9.99999997E-7 : f32
    %323 = vector.broadcast %cst_110 : f32 to vector<16x1xf32>
    %324 = arith.addf %322, %323 : vector<16x1xf32>
    %cst_111 = arith.constant 1.000000e+00 : f32
    %325 = vector.broadcast %cst_111 : f32 to vector<16x1xf32>
    %326 = arith.divf %325, %324 : vector<16x1xf32>
    %327 = vector.broadcast %326 : vector<16x1xf32> to vector<16x32xf32>
    %328 = arith.mulf %316, %327 : vector<16x32xf32>
    %329 = vector.broadcast %309 : vector<1x32xf32> to vector<16x32xf32>
    %330 = arith.mulf %329, %328 : vector<16x32xf32>
    %331 = vector.broadcast %310 : vector<1x32xf32> to vector<16x32xf32>
    %332 = arith.addf %330, %331 : vector<16x32xf32>
    %333 = vector.shape_cast %332 : vector<16x32xf32> to vector<2x8x32xf32>
    %c0_112 = arith.constant 0 : index
    %c0_113 = arith.constant 0 : index
    %c0_114 = arith.constant 0 : index
    %334 = vector.load %arg8[%c0_112, %c0_113, %c0_114] : memref<2x8x32xf32, #tpu.memory_space<vmem>>, vector<2x8x32xf32>
    tpu.vector_store %arg8[%c0_112, %c0_113, %c0_114], %333 {strides = array<i32>} : memref<2x8x32xf32, #tpu.memory_space<vmem>>, vector<2x8x32xf32>,
    return
  }
  func.func @transform_0(%arg0: i32) -> (i32, i32, i32) {
    %c0_i32 = arith.constant 0 : i32
    %c0_i32_0 = arith.constant 0 : i32
    %c0_i32_1 = arith.constant 0 : i32
    return %arg0, %c0_i32, %c0_i32_0 : i32, i32, i32
  }
  func.func @transform_1(%arg0: i32) -> (i32, i32, i32) {
    %c0_i32 = arith.constant 0 : i32
    %c0_i32_0 = arith.constant 0 : i32
    %c0_i32_1 = arith.constant 0 : i32
    return %arg0, %c0_i32, %c0_i32_0 : i32, i32, i32
  }
  func.func @transform_2(%arg0: i32) -> (i32, i32, i32) {
    %c0_i32 = arith.constant 0 : i32
    %c0_i32_0 = arith.constant 0 : i32
    %c0_i32_1 = arith.constant 0 : i32
    return %arg0, %c0_i32, %c0_i32_0 : i32, i32, i32
  }
  func.func @transform_3(%arg0: i32) -> (i32, i32, i32) {
    %c0_i32 = arith.constant 0 : i32
    %c0_i32_0 = arith.constant 0 : i32
    %c0_i32_1 = arith.constant 0 : i32
    return %arg0, %c0_i32, %c0_i32_0 : i32, i32, i32
  }
  func.func @transform_4(%arg0: i32) -> (i32, i32) {
    %c0_i32 = arith.constant 0 : i32
    %c0_i32_0 = arith.constant 0 : i32
    %c0_i32_1 = arith.constant 0 : i32
    return %c0_i32, %c0_i32_0 : i32, i32
  }
  func.func @transform_5(%arg0: i32) -> (i32, i32) {
    %c0_i32 = arith.constant 0 : i32
    %c0_i32_0 = arith.constant 0 : i32
    %c0_i32_1 = arith.constant 0 : i32
    return %c0_i32, %c0_i32_0 : i32, i32
  }
  func.func @transform_6(%arg0: i32) -> (i32, i32) {
    %c0_i32 = arith.constant 0 : i32
    %c0_i32_0 = arith.constant 0 : i32
    %c0_i32_1 = arith.constant 0 : i32
    return %c0_i32, %c0_i32_0 : i32, i32
  }
  func.func @transform_7(%arg0: i32) -> (i32, i32, i32) {
    %c0_i32 = arith.constant 0 : i32
    %c0_i32_0 = arith.constant 0 : i32
    %c0_i32_1 = arith.constant 0 : i32
    return %arg0, %c0_i32, %c0_i32_0 : i32, i32, i32
  }
}

</mosaic_0001>

<bundles_post_ra>
// kernel: fma_forward.1
= control target key start
LH: loop header
LB: loop body
LE: loop exit
PB: predicated region body
PF: predicated region fallthrough
CT: control target
= control target key end

     0   :  { %12 = vsyncpa [#allocation3], 0  ;;  %s4354_s0 = inlined_call_operand.hbm [shape: f32[2,8,32], index: 0, kind: input, shape index: {}]   ;;  %s4355_s1 = inlined_call_operand.vmem [shape: f32[2,16,32], index: 1, kind: input, shape index: {}]   ;;  %s4356_s2 = inlined_call_operand.vmem [shape: f32[2,1,8], index: 2, kind: input, shape index: {}]   ;;  %s4357_s3 = inlined_call_operand.vmem [shape: f32[2,1,16], index: 3, kind: input, shape index: {}]   ;;  %s4358_s4 = inlined_call_operand.vmem [shape: bf16[32,448], index: 4, kind: input, shape index: {}]   ;;  %s4359_s5 = inlined_call_operand.vmem [shape: bf16[128,32], index: 5, kind: input, shape index: {}]   ;;  %s4360_s6 = inlined_call_operand.hbm [shape: f32[13,128], index: 6, kind: input, shape index: {}]   ;;  %s4361_s7 = inlined_call_operand.hbm [shape: f32[2,8,32], index: 7, kind: output, shape index: {}]  }
   0x1   :  { %13 = vsyncpa [#allocation6], 0 }
   0x2   :  { %14 = vsyncpa [#allocation4], 0  ;;  %s3669_s24 = smov [#allocation2]   ;;  %s3597_s28 = scalar_lea.hbm %s4354_s0, 256 }
   0x3   :  { %s20_s25 = sshll.u32 %s3669_s24, 4  ;;  %p3598_p0 = scmp.ne.s32.totalorder %s4354_s0, %s3597_s28  ;;  %s21_s25 = int_to_ptr.vmem [resolvable:$true] %s20_s25 }
   0x4   :  { %p3601_p1 = scmp.lt.u32.totalorder %s3597_s28, %s4354_s0 }
   0x6   :  { %p3603_p2 = pnand %p3601_p1, %p3598_p0 }
   0x8   :  { %3606 = shalt.err (!%p3603_p2)
}
   0x9   :  { %s3607_s10 = scalar_lea.vmem %s21_s25, 256  ;;  %p3612_p4 = scmp.lt.s32.totalorder %s21_s25, %s21_s25 }
   0xa   :  { %p3608_p3 = scmp.ne.s32.totalorder %s21_s25, %s3607_s10  ;;  %p3613_p5 = scmp.lt.s32.totalorder %s3607_s10, %s3607_s10 }
   0xc   :  { %p3614_p6 = por %p3613_p5, %p3612_p4 }
   0xe   :  { %p3615_p7 = pnand %p3614_p6, %p3608_p3 }
  0x10   :  { %3618 = shalt.err (!%p3615_p7)
}
  0x11   :  { %s3670_s11 = smov 128   ;;  %s3671_s12 = smov 8  }
  0x12   :  { %26 = dma.hbm_to_vmem [thread:$0]  %s4354_s0, 256, %s21_s25, [#allocation3], %s3670_s11, %s3670_s11, %s3671_s12  }
  0x13   :  { %s3672_s15 = smov [#allocation5]   ;;  %s3619_s19 = scalar_lea.hbm %s4360_s6, 256 }
  0x14   :  { %s42_s16 = sshll.u32 %s3672_s15, 4  ;;  %p3620_p8 = scmp.ne.s32.totalorder %s4360_s6, %s3619_s19  ;;  %s43_s16 = int_to_ptr.vmem [resolvable:$true] %s42_s16 }
  0x15   :  { %p3623_p9 = scmp.lt.u32.totalorder %s3619_s19, %s4360_s6 }
  0x17   :  { %p3625_p10 = pnand %p3623_p9, %p3620_p8 }
  0x19   :  { %3628 = shalt.err (!%p3625_p10)
}
  0x1a   :  { %s3629_s24 = scalar_lea.vmem %s43_s16, 256  ;;  %p3634_p12 = scmp.lt.s32.totalorder %s43_s16, %s43_s16 }
  0x1b   :  { %p3630_p11 = scmp.ne.s32.totalorder %s43_s16, %s3629_s24  ;;  %p3635_p13 = scmp.lt.s32.totalorder %s3629_s24, %s3629_s24 }
  0x1d   :  { %p3636_p0 = por %p3635_p13, %p3634_p12 }
  0x1f   :  { %p3637_p1 = pnand %p3636_p0, %p3630_p11 }
  0x21   :  { %3640 = shalt.err (!%p3637_p1)
}
  0x22   :  { %48 = dma.hbm_to_vmem [thread:$0]  %s4360_s6, 256, %s43_s16, [#allocation6], %s3670_s11, %s3670_s11, %s3671_s12  }
  0x23   :  { %3663 = dma.done.wait [#allocation3], 256  }
  0x24   :  { %3664 = vsyncadd [#allocation3], 4294967040 }
  0x25   :  { %3665 = dma.done.wait [#allocation6], 256  }
  0x26   :  { %3666 = vsyncadd [#allocation6], 4294967040  ;;  %v3673_v0 = vmov 0.0   ;;  %vm3674_vm0 = vmmov 0   ;;  %v3467_v1 = vld [vmem:[%s4358_s4] ss:$16 sps:$4 sm:$0xff]  }
  0x27   :  { %3124 = vmatprep.subr.bf16.mxu1 %v3673_v0  ;;  %3128 = vmatprep.mubr.msk.bf16.mxu1 %vm3674_vm0, %v3673_v0  ;;  %v3468_v2 = vld [vmem:[%s4358_s4 + $0x20] ss:$16 sps:$4 sm:$0xff]   ;;  %v3774_v4 = vld [vmem:[#allocation2 + $0x8] sm:$0xff]  ;;  %vm88_vm1 = vcmask 261120   ;;  %s3675_s29 = smov 96   ;;  %vm153_vm2 = vcmask 64512  }
  0x28   :  { %3150 = vmatprep.subr.bf16.mxu0 %v3673_v0  ;;  %3152 = vmatprep.mubr.msk.bf16.mxu0 %vm3674_vm0, %v3673_v0  ;;  %v3772_v3 = vld [vmem:[#allocation2] sm:$0xff]  ;;  %v2923_v6 = vld [vmem:[#allocation5] ss:$0 sm:$0xff]  ;;  %s3676_s13 = smov 64   ;;  %s3677_s14 = smov 88   ;;  %vm281_vm3 = vcmask 1043456  }
  0x29   :  { %3125 = vmatpush3.bf16.msra.mxu1 %v3467_v1  ;;  %v3779_v5 = vpack.c.bf16 %v3774_v4, %v3772_v3  ;;  %v3809_v20 = vld [vmem:[%s4356_s2] ss:$0 sm:$0xff]  ;;  %v3816_v28 = vld [vmem:[%s4356_s2 + $0x1] ss:$0 sm:$0xff]  ;;  %s3678_s2 = smov 120   ;;  %s3679_s15 = smov 56  }
  0x2a   :  { %3126 = vmatprep.subr.bf16.mxu1 %v3673_v0  ;;  %s3680_s16 = smov 80   ;;  %s3681_s17 = smov 112   ;;  %vm1071_vm4 = vcmask 130048   ;;  %vm1074_vm5 = vcmask 195584   ;;  %vm2683_vm10 = vcmask 523264  }
  0x2b   :  { %s3682_s18 = smov 48   ;;  %s3683_s19 = smov 72  }
  0x2c   :  { %s3684_s20 = smov 104   ;;  %s3685_s21 = smov 40  }
  0x2d   :  { %3127 = vmatpush3.bf16.msra.mxu1 %v3468_v2  ;;  %s3686_s24 = smov 32   ;;  %s3687_s0 = smov 16  }
  0x2e   :  { %3132 = vmatprep.subr.bf16.mxu1 %v3673_v0  ;;  %s3688_s28 = smov 24  }
  0x30   :  { %3129 = vmatmul.mubr.msk.bf16.vlgmr.msra.gmra.mrb[0].mxu1 %vm88_vm1, %v3779_v5 }
  0x31   :  { %3134 = vmatprep.mubr.msk.bf16.mxu1 %vm3674_vm0, %v3673_v0 }
 0x103   :  { %v126_v7 = vpop.f32.mrb[0].mxu1 }
 0x104   :  { %v127_v8 = vadd.f32 %v2923_v6, %v126_v7  ;;  %v3130_v9 = vpop.f32.mrb[1].mxu1 }
 0x105   :  { %v129_v10 = vpop.f32.mrb[2].mxu1 }
 0x106   :  { %v3786_v11 = vpack.c.bf16 %v127_v8, %v127_v8  ;;  %v130_v12 = vadd.f32 %v2923_v6, %v129_v10  ;;  %v3131_v13 = vpop.f32.mrb[3].mxu1 }
 0x108   :  { %151 = vrot.lane.b32.xlu0 %v3786_v11, %s3675_s29  ;;  %v3790_v14 = vpack.c.bf16 %v130_v12, %v130_v12 }
 0x10c   :  { %200 = vrot.lane.b32.xlu0 %v3790_v14, %s3675_s29 }
 0x17a   :  { %v152_v15 = vpop.permute.xlu0 %151 }
 0x17b   :  { %v158_v16 = vsel %vm153_vm2, %v152_v15, 0 }
 0x17c   :  { %3133 = vmatpush3.bf16.xpose.msra.mxu1 %v158_v16 }
 0x17d   :  { %3138 = vmatprep.subr.bf16.mxu1 %v3673_v0 }
 0x17e   :  { %v201_v17 = vpop.permute.xlu0 %200 }
 0x17f   :  { %v206_v18 = vsel %vm153_vm2, %v201_v17, 0 }
 0x183   :  { %3135 = vmatmul.mubr.msk.bf16.vlgmr.msra.gmra.mrb[4].mxu1 %vm153_vm2, %v3786_v11 }
 0x184   :  { %3139 = vmatpush3.bf16.xpose.msra.mxu1 %v206_v18  ;;  %3140 = vmatprep.mubr.msk.bf16.mxu1 %vm3674_vm0, %v3673_v0 }
 0x185   :  { %3144 = vmatprep.subr.bf16.mxu1 %v3673_v0 }
 0x18b   :  { %3141 = vmatmul.mubr.msk.bf16.vlgmr.msra.gmra.mrb[8].mxu1 %vm153_vm2, %v3790_v14 }
 0x18c   :  { %3146 = vmatprep.mubr.msk.bf16.mxu1 %vm3674_vm0, %v3673_v0 }
 0x256   :  { %v194_v19 = vpop.f32.mrb[4].mxu1 }
 0x257   :  { %v248_v21 = vmul.f32 0.35355338, %v194_v19  ;;  %v3136_v22 = vpop.f32.mrb[5].mxu1 }
 0x258   :  { %v197_v23 = vpop.f32.mrb[6].mxu1 }
 0x259   :  { %v3137_v24 = vpop.f32.mrb[7].mxu1  ;;  %v250_v25 = vadd.f32 %v3809_v20, %v248_v21 }
 0x25b   :  { %v252_v26 = vsel %vm153_vm2, %v250_v25, -inf }
 0x25c   :  { %253 = vmax.xlane.f32.xlu1 %v252_v26 }
 0x25e   :  { %v242_v27 = vpop.f32.mrb[8].mxu1 }
 0x25f   :  { %v249_v29 = vmul.f32 0.35355338, %v242_v27  ;;  %v3142_v30 = vpop.f32.mrb[9].mxu1 }
 0x260   :  { %v245_v31 = vpop.f32.mrb[10].mxu1 }
 0x261   :  { %v3143_v32 = vpop.f32.mrb[11].mxu1  ;;  %v251_v33 = vadd.f32 %v3816_v28, %v249_v29 }
 0x263   :  { %v255_v34 = vsel %vm153_vm2, %v251_v33, -inf }
 0x264   :  { %256 = vmax.xlane.f32.xlu1 %v255_v34 }
 0x275   :  { %276 = vrot.lane.b32.xlu1 %v3786_v11, %s3676_s13 }
 0x279   :  { %325 = vrot.lane.b32.xlu1 %v3790_v14, %s3676_s13 }
 0x27d   :  { %375 = vrot.lane.b32.xlu1 %v3786_v11, %s3677_s14 }
 0x2e9   :  { %v254_v35 = vpop.xlane.xlu1 %253 }
 0x2ea   :  { %v258_v36 = vsub.f32 %v250_v25, %v254_v35 }
 0x2ec   :  { %v260_v37 = vmul.f32 1.442695, %v258_v36 }
 0x2ee   :  { %3493 = vpow2.f32 %v260_v37 }
 0x2f1   :  { %v257_v38 = vpop.xlane.xlu1 %256 }
 0x2f2   :  { %v259_v39 = vsub.f32 %v251_v33, %v257_v38 }
 0x2f4   :  { %v262_v40 = vmul.f32 1.442695, %v259_v39 }
 0x2f5   :  { %v277_v41 = vpop.permute.xlu1 %276 }
 0x2f6   :  { %3495 = vpow2.f32 %v262_v40  ;;  %v283_v42 = vsel %vm281_vm3, %v277_v41, 0 }
 0x2f7   :  { %3145 = vmatpush3.bf16.msra.mxu1 %v283_v42 }
 0x2f8   :  { %v3494_v43 = vpop.eup %3493  ;;  %3156 = vmatprep.subr.bf16.mxu1 %v3673_v0 }
 0x2f9   :  { %v326_v44 = vpop.permute.xlu1 %325  ;;  %v264_v45 = vsel %vm153_vm2, %v3494_v43, 0.0 }
 0x2fa   :  { %265 = vadd.xlane.f32.xlu0 %v264_v45  ;;  %v331_v46 = vsel %vm281_vm3, %v326_v44, 0 }
 0x2fb   :  { %3151 = vmatpush3.bf16.msra.mxu0 %v331_v46 }
 0x2fc   :  { %3162 = vmatprep.subr.bf16.mxu0 %v3673_v0 }
 0x2fd   :  { %v376_v50 = vpop.permute.xlu1 %375 }
 0x2fe   :  { %v381_v55 = vsel %vm153_vm2, %v376_v50, 0 }
 0x300   :  { %v3496_v47 = vpop.eup %3495 }
 0x301   :  { %v267_v48 = vsel %vm153_vm2, %v3496_v47, 0.0 }
 0x302   :  { %268 = vadd.xlane.f32.xlu1 %v267_v48 }
 0x310   :  { %373 = vrot.lane.b32.xlu0 %v3786_v11, %s3678_s2 }
 0x313   :  { %425 = vrot.lane.b32.xlu1 %v3790_v14, %s3677_s14 }
 0x317   :  { %423 = vrot.lane.b32.xlu1 %v3790_v14, %s3678_s2 }
 0x387   :  { %v266_v49 = vpop.xlane.xlu0 %265 }
 0x388   :  { %3497 = vrcp.f32 %v266_v49 }
 0x38b   :  { %v374_v60 = vpop.permute.xlu0 %373 }
 0x38f   :  { %v269_v51 = vpop.xlane.xlu1 %268 }
 0x390   :  { %3499 = vrcp.f32 %v269_v51 }
 0x392   :  { %v3498_v52 = vpop.eup %3497 }
 0x393   :  { %v272_v53 = vmul.f32 %v3498_v52, %v3494_v43  ;;  %v426_v58 = vpop.permute.xlu1 %425 }
 0x394   :  { %v431_v61 = vsel %vm153_vm2, %v426_v58, 0 }
 0x395   :  { %v274_v54 = vpack.c.bf16 %v272_v53, %v272_v53 }
 0x397   :  { %3147 = vmatmul.mubr.msk.bf16.vlgmr.msra.gmra.mrb[12].mxu1 %vm153_vm2, %v274_v54  ;;  %v424_v62 = vpop.permute.xlu1 %423 }
 0x398   :  { %3157 = vmatpush3.bf16.xpose.msra.mxu1 %v381_v55  ;;  %3158 = vmatprep.mubr.msk.bf16.mxu1 %vm3674_vm0, %v3673_v0 }
 0x399   :  { %3168 = vmatprep.subr.bf16.mxu1 %v3673_v0 }
 0x39a   :  { %v3500_v56 = vpop.eup %3499 }
 0x39b   :  { %v273_v57 = vmul.f32 %v3500_v56, %v3496_v47 }
 0x39d   :  { %v275_v59 = vpack.c.bf16 %v273_v57, %v273_v57 }
 0x39f   :  { %3153 = vmatmul.mubr.msk.bf16.vlgmr.msra.gmra.mrb[0].mxu0 %vm153_vm2, %v275_v59  ;;  %3159 = vmatmul.mubr.msk.bf16.vlgmr.msra.gmra.mrb[16].mxu1 %vm153_vm2, %v374_v60 }
 0x3a0   :  { %3163 = vmatpush3.bf16.xpose.msra.mxu0 %v431_v61  ;;  %3164 = vmatprep.mubr.msk.bf16.mxu0 %vm3674_vm0, %v3673_v0 }
 0x3a1   :  { %3174 = vmatprep.subr.bf16.mxu0 %v3673_v0  ;;  %3170 = vmatprep.mubr.msk.bf16.mxu1 %vm3674_vm0, %v3673_v0 }
 0x3a7   :  { %3165 = vmatmul.mubr.msk.bf16.vlgmr.msra.gmra.mrb[4].mxu0 %vm153_vm2, %v424_v62 }
 0x3a8   :  { %3176 = vmatprep.mubr.msk.bf16.mxu0 %vm3674_vm0, %v3673_v0 }
 0x46a   :  { %v3854_v63 = vpop.f32.mrb[12].mxu1 }
 0x46b   :  { %v3148_v1 = vpop.f32.mrb[13].mxu1 }
 0x46c   :  { %v322_v2 = vpop.f32.mrb[14].mxu1 }
 0x46d   :  { %v3149_v6 = vpop.f32.mrb[15].mxu1 }
 0x472   :  { %v3856_v7 = vpop.f32.mrb[0].mxu0  ;;  %v417_v8 = vpop.f32.mrb[16].mxu1 }
 0x473   :  { %v473_v9 = vmul.f32 0.35355338, %v417_v8  ;;  %v3154_v10 = vpop.f32.mrb[1].mxu0  ;;  %v3160_v12 = vpop.f32.mrb[17].mxu1 }
 0x474   :  { %v370_v13 = vpop.f32.mrb[2].mxu0  ;;  %v420_v15 = vpop.f32.mrb[18].mxu1 }
 0x475   :  { %v3155_v16 = vpop.f32.mrb[3].mxu0  ;;  %v3161_v17 = vpop.f32.mrb[19].mxu1  ;;  %v475_v18 = vadd.f32 %v3809_v20, %v473_v9 }
 0x477   :  { %v477_v19 = vsel %vm153_vm2, %v475_v18, -inf }
 0x478   :  { %478 = vmax.xlane.f32.xlu1 %v477_v19 }
 0x47a   :  { %v467_v21 = vpop.f32.mrb[4].mxu0 }
 0x47b   :  { %v474_v22 = vmul.f32 0.35355338, %v467_v21  ;;  %v3166_v23 = vpop.f32.mrb[5].mxu0 }
 0x47c   :  { %v470_v24 = vpop.f32.mrb[6].mxu0 }
 0x47d   :  { %v3167_v25 = vpop.f32.mrb[7].mxu0  ;;  %v476_v26 = vadd.f32 %v3816_v28, %v474_v22 }
 0x47f   :  { %v480_v27 = vsel %vm153_vm2, %v476_v26, -inf }
 0x480   :  { %481 = vmax.xlane.f32.xlu0 %v480_v27 }
 0x489   :  { %501 = vrot.lane.b32.xlu1 %v3786_v11, %s3679_s15 }
 0x48d   :  { %599 = vrot.lane.b32.xlu1 %v3786_v11, %s3680_s16 }
 0x496   :  { %549 = vrot.lane.b32.xlu0 %v3790_v14, %s3679_s15 }
 0x49a   :  { %597 = vrot.lane.b32.xlu0 %v3786_v11, %s3681_s17 }
 0x505   :  { %v479_v29 = vpop.xlane.xlu1 %478 }
 0x506   :  { %v483_v30 = vsub.f32 %v475_v18, %v479_v29 }
 0x508   :  { %v485_v31 = vmul.f32 1.442695, %v483_v30 }
 0x509   :  { %v502_v32 = vpop.permute.xlu1 %501 }
 0x50a   :  { %3501 = vpow2.f32 %v485_v31  ;;  %v507_v33 = vsel %vm281_vm3, %v502_v32, 0 }
 0x50b   :  { %3169 = vmatpush3.bf16.msra.mxu1 %v507_v33 }
 0x50c   :  { %3180 = vmatprep.subr.bf16.mxu1 %v3673_v0 }
 0x50d   :  { %v482_v34 = vpop.xlane.xlu0 %481  ;;  %v600_v43 = vpop.permute.xlu1 %599 }
 0x50e   :  { %v484_v35 = vsub.f32 %v476_v26, %v482_v34  ;;  %v605_v49 = vsel %vm153_vm2, %v600_v43, 0 }
 0x510   :  { %v487_v36 = vmul.f32 1.442695, %v484_v35 }
 0x511   :  { %v550_v37 = vpop.permute.xlu0 %549 }
 0x512   :  { %3503 = vpow2.f32 %v487_v36  ;;  %v555_v38 = vsel %vm281_vm3, %v550_v37, 0 }
 0x513   :  { %3175 = vmatpush3.bf16.msra.mxu0 %v555_v38 }
 0x514   :  { %v3502_v39 = vpop.eup %3501  ;;  %3186 = vmatprep.subr.bf16.mxu0 %v3673_v0 }
 0x515   :  { %v489_v40 = vsel %vm153_vm2, %v3502_v39, 0.0  ;;  %v598_v54 = vpop.permute.xlu0 %597 }
 0x516   :  { %490 = vadd.xlane.f32.xlu1 %v489_v40 }
 0x51c   :  { %v3504_v41 = vpop.eup %3503 }
 0x51d   :  { %v492_v42 = vsel %vm153_vm2, %v3504_v41, 0.0 }
 0x51e   :  { %493 = vadd.xlane.f32.xlu1 %v492_v42 }
 0x52f   :  { %649 = vrot.lane.b32.xlu1 %v3790_v14, %s3680_s16 }
 0x533   :  { %647 = vrot.lane.b32.xlu1 %v3790_v14, %s3681_s17 }
 0x5a3   :  { %v491_v44 = vpop.xlane.xlu1 %490 }
 0x5a4   :  { %3505 = vrcp.f32 %v491_v44 }
 0x5ab   :  { %v494_v45 = vpop.xlane.xlu1 %493 }
 0x5ac   :  { %3507 = vrcp.f32 %v494_v45 }
 0x5ae   :  { %v3506_v46 = vpop.eup %3505 }
 0x5af   :  { %v497_v47 = vmul.f32 %v3506_v46, %v3502_v39  ;;  %v650_v52 = vpop.permute.xlu1 %649 }
 0x5b0   :  { %v655_v55 = vsel %vm153_vm2, %v650_v52, 0 }
 0x5b1   :  { %v499_v48 = vpack.c.bf16 %v497_v47, %v497_v47 }
 0x5b3   :  { %3171 = vmatmul.mubr.msk.bf16.vlgmr.msra.gmra.mrb[20].mxu1 %vm153_vm2, %v499_v48  ;;  %v648_v56 = vpop.permute.xlu1 %647 }
 0x5b4   :  { %3181 = vmatpush3.bf16.xpose.msra.mxu1 %v605_v49  ;;  %3182 = vmatprep.mubr.msk.bf16.mxu1 %vm3674_vm0, %v3673_v0 }
 0x5b5   :  { %3192 = vmatprep.subr.bf16.mxu1 %v3673_v0 }
 0x5b6   :  { %v3508_v50 = vpop.eup %3507 }
 0x5b7   :  { %v498_v51 = vmul.f32 %v3508_v50, %v3504_v41 }
 0x5b9   :  { %v500_v53 = vpack.c.bf16 %v498_v51, %v498_v51 }
 0x5bb   :  { %3177 = vmatmul.mubr.msk.bf16.vlgmr.msra.gmra.mrb[8].mxu0 %vm153_vm2, %v500_v53  ;;  %3183 = vmatmul.mubr.msk.bf16.vlgmr.msra.gmra.mrb[24].mxu1 %vm153_vm2, %v598_v54 }
 0x5bc   :  { %3187 = vmatpush3.bf16.xpose.msra.mxu0 %v655_v55  ;;  %3188 = vmatprep.mubr.msk.bf16.mxu0 %vm3674_vm0, %v3673_v0 }
 0x5bd   :  { %3198 = vmatprep.subr.bf16.mxu0 %v3673_v0  ;;  %3194 = vmatprep.mubr.msk.bf16.mxu1 %vm3674_vm0, %v3673_v0 }
 0x5c3   :  { %3189 = vmatmul.mubr.msk.bf16.vlgmr.msra.gmra.mrb[12].mxu0 %vm153_vm2, %v648_v56 }
 0x5c4   :  { %3200 = vmatprep.mubr.msk.bf16.mxu0 %vm3674_vm0, %v3673_v0 }
 0x686   :  { %v3894_v57 = vpop.f32.mrb[20].mxu1 }
 0x687   :  { %v3172_v58 = vpop.f32.mrb[21].mxu1 }
 0x688   :  { %v546_v59 = vpop.f32.mrb[22].mxu1 }
 0x689   :  { %v3173_v60 = vpop.f32.mrb[23].mxu1 }
 0x68e   :  { %v3896_v61 = vpop.f32.mrb[8].mxu0  ;;  %v641_v62 = vpop.f32.mrb[24].mxu1 }
 0x68f   :  { %v3437_v1 = vpack.i.bf16 %v3896_v61, %v3894_v57  ;;  %v697_v2 = vmul.f32 0.35355338, %v641_v62  ;;  %v3178_v6 = vpop.f32.mrb[9].mxu0  ;;  %v3184_v8 = vpop.f32.mrb[25].mxu1 }
 0x690   :  { %v594_v9 = vpop.f32.mrb[10].mxu0  ;;  %v644_v10 = vpop.f32.mrb[26].mxu1 }
 0x691   :  { %v3179_v12 = vpop.f32.mrb[11].mxu0  ;;  %v3185_v13 = vpop.f32.mrb[27].mxu1  ;;  %v699_v15 = vadd.f32 %v3809_v20, %v697_v2 }
 0x693   :  { %v701_v16 = vsel %vm153_vm2, %v699_v15, -inf }
 0x694   :  { %702 = vmax.xlane.f32.xlu0 %v701_v16 }
 0x696   :  { %v691_v17 = vpop.f32.mrb[12].mxu0 }
 0x697   :  { %v698_v18 = vmul.f32 0.35355338, %v691_v17  ;;  %v3190_v19 = vpop.f32.mrb[13].mxu0 }
 0x698   :  { %v694_v21 = vpop.f32.mrb[14].mxu0 }
 0x699   :  { %v3191_v22 = vpop.f32.mrb[15].mxu0  ;;  %v700_v23 = vadd.f32 %v3816_v28, %v698_v18 }
 0x69b   :  { %v704_v24 = vsel %vm153_vm2, %v700_v23, -inf }
 0x69c   :  { %705 = vmax.xlane.f32.xlu1 %v704_v24 }
 0x6ad   :  { %725 = vrot.lane.b32.xlu1 %v3786_v11, %s3682_s18 }
 0x6b1   :  { %823 = vrot.lane.b32.xlu1 %v3786_v11, %s3683_s19 }
 0x6b5   :  { %873 = vrot.lane.b32.xlu1 %v3790_v14, %s3683_s19 }
 0x6b9   :  { %871 = vrot.lane.b32.xlu1 %v3790_v14, %s3684_s20 }
 0x721   :  { %v703_v25 = vpop.xlane.xlu0 %702 }
 0x722   :  { %v707_v26 = vsub.f32 %v699_v15, %v703_v25 }
 0x724   :  { %v709_v27 = vmul.f32 1.442695, %v707_v26 }
 0x726   :  { %3509 = vpow2.f32 %v709_v27 }
 0x729   :  { %v706_v29 = vpop.xlane.xlu1 %705 }
 0x72a   :  { %v708_v30 = vsub.f32 %v700_v23, %v706_v29 }
 0x72c   :  { %v711_v31 = vmul.f32 1.442695, %v708_v30 }
 0x72d   :  { %v726_v32 = vpop.permute.xlu1 %725 }
 0x72e   :  { %3511 = vpow2.f32 %v711_v31  ;;  %v731_v33 = vsel %vm281_vm3, %v726_v32, 0 }
 0x72f   :  { %3193 = vmatpush3.bf16.msra.mxu1 %v731_v33 }
 0x730   :  { %v3510_v34 = vpop.eup %3509  ;;  %3204 = vmatprep.subr.bf16.mxu1 %v3673_v0 }
 0x731   :  { %v713_v35 = vsel %vm153_vm2, %v3510_v34, 0.0  ;;  %v824_v43 = vpop.permute.xlu1 %823 }
 0x732   :  { %714 = vadd.xlane.f32.xlu0 %v713_v35  ;;  %v829_v46 = vsel %vm153_vm2, %v824_v43, 0  ;;  %v3470_v43 = vld [vmem:[%s4358_s4 + $0x20] ss:$16 sps:$4 sm:$0xff]  }
 0x735   :  { %v874_v49 = vpop.permute.xlu1 %873 }
 0x736   :  { %v879_v52 = vsel %vm153_vm2, %v874_v49, 0 }
 0x738   :  { %v3512_v36 = vpop.eup %3511 }
 0x739   :  { %v716_v37 = vsel %vm153_vm2, %v3512_v36, 0.0  ;;  %v872_v53 = vpop.permute.xlu1 %871 }
 0x73a   :  { %717 = vadd.xlane.f32.xlu0 %v716_v37 }
 0x750   :  { %773 = vrot.lane.b32.xlu0 %v3790_v14, %s3682_s18 }
 0x754   :  { %821 = vrot.lane.b32.xlu0 %v3786_v11, %s3684_s20 }
 0x7bf   :  { %v715_v38 = vpop.xlane.xlu0 %714 }
 0x7c0   :  { %3513 = vrcp.f32 %v715_v38 }
 0x7c7   :  { %v718_v39 = vpop.xlane.xlu0 %717 }
 0x7c8   :  { %3515 = vrcp.f32 %v718_v39 }
 0x7ca   :  { %v3514_v40 = vpop.eup %3513 }
 0x7cb   :  { %v721_v41 = vmul.f32 %v3514_v40, %v3510_v34  ;;  %v774_v42 = vpop.permute.xlu0 %773 }
 0x7cc   :  { %v779_v44 = vsel %vm281_vm3, %v774_v42, 0 }
 0x7cd   :  { %3199 = vmatpush3.bf16.msra.mxu0 %v779_v44  ;;  %v723_v45 = vpack.c.bf16 %v721_v41, %v721_v41 }
 0x7ce   :  { %3210 = vmatprep.subr.bf16.mxu0 %v3673_v0 }
 0x7cf   :  { %3195 = vmatmul.mubr.msk.bf16.vlgmr.msra.gmra.mrb[28].mxu1 %vm153_vm2, %v723_v45  ;;  %v822_v51 = vpop.permute.xlu0 %821 }
 0x7d0   :  { %3205 = vmatpush3.bf16.xpose.msra.mxu1 %v829_v46  ;;  %3206 = vmatprep.mubr.msk.bf16.mxu1 %vm3674_vm0, %v3673_v0 }
 0x7d1   :  { %3216 = vmatprep.subr.bf16.mxu1 %v3673_v0 }
 0x7d2   :  { %v3516_v47 = vpop.eup %3515 }
 0x7d3   :  { %v722_v48 = vmul.f32 %v3516_v47, %v3512_v36 }
 0x7d5   :  { %v724_v50 = vpack.c.bf16 %v722_v48, %v722_v48 }
 0x7d7   :  { %3201 = vmatmul.mubr.msk.bf16.vlgmr.msra.gmra.mrb[16].mxu0 %vm153_vm2, %v724_v50  ;;  %3207 = vmatmul.mubr.msk.bf16.vlgmr.msra.gmra.mrb[32].mxu1 %vm153_vm2, %v822_v51  ;;  %v3472_v50 = vld [vmem:[%s4358_s4 + $0x28] ss:$16 sps:$4 sm:$0xff]  }
 0x7d8   :  { %3211 = vmatpush3.bf16.xpose.msra.mxu0 %v879_v52  ;;  %3212 = vmatprep.mubr.msk.bf16.mxu0 %vm3674_vm0, %v3673_v0 }
 0x7d9   :  { %3222 = vmatprep.subr.bf16.mxu0 %v3673_v0  ;;  %3218 = vmatprep.mubr.msk.bf16.mxu1 %vm3674_vm0, %v3673_v0 }
 0x7df   :  { %3213 = vmatmul.mubr.msk.bf16.vlgmr.msra.gmra.mrb[20].mxu0 %vm153_vm2, %v872_v53 }
 0x7e0   :  { %3224 = vmatprep.mubr.msk.bf16.mxu0 %vm3674_vm0, %v3673_v0 }
 0x8a2   :  { %v767_v54 = vpop.f32.mrb[28].mxu1 }
 0x8a3   :  { %v3196_v55 = vpop.f32.mrb[29].mxu1 }
 0x8a4   :  { %v770_v56 = vpop.f32.mrb[30].mxu1 }
 0x8a5   :  { %v3197_v58 = vpop.f32.mrb[31].mxu1  ;;  %v3471_v56 = vld [vmem:[%s4358_s4 + $0x8] ss:$16 sps:$4 sm:$0xff]  }
 0x8aa   :  { %v815_v59 = vpop.f32.mrb[16].mxu0  ;;  %v865_v60 = vpop.f32.mrb[32].mxu1 }
 0x8ab   :  { %v3442_v62 = vpack.i.bf16 %v815_v59, %v767_v54  ;;  %v921_v2 = vmul.f32 0.35355338, %v865_v60  ;;  %v3202_v6 = vpop.f32.mrb[17].mxu0  ;;  %v3208_v8 = vpop.f32.mrb[33].mxu1 }
 0x8ac   :  { %v818_v9 = vpop.f32.mrb[18].mxu0  ;;  %v868_v10 = vpop.f32.mrb[34].mxu1 }
 0x8ad   :  { %v3203_v12 = vpop.f32.mrb[19].mxu0  ;;  %v3209_v13 = vpop.f32.mrb[35].mxu1  ;;  %v923_v15 = vadd.f32 %v3809_v20, %v921_v2  ;;  %v3469_v20 = vld [vmem:[%s4358_s4] ss:$16 sps:$4 sm:$0xff]  }
 0x8af   :  { %v925_v16 = vsel %vm153_vm2, %v923_v15, -inf }
 0x8b0   :  { %926 = vmax.xlane.f32.xlu0 %v925_v16 }
 0x8b2   :  { %v915_v17 = vpop.f32.mrb[20].mxu0 }
 0x8b3   :  { %v922_v18 = vmul.f32 0.35355338, %v915_v17  ;;  %v3214_v19 = vpop.f32.mrb[21].mxu0 }
 0x8b4   :  { %v918_v21 = vpop.f32.mrb[22].mxu0 }
 0x8b5   :  { %v3215_v22 = vpop.f32.mrb[23].mxu0  ;;  %v924_v23 = vadd.f32 %v3816_v28, %v922_v18 }
 0x8b7   :  { %v928_v24 = vsel %vm153_vm2, %v924_v23, -inf }
 0x8b8   :  { %929 = vmax.xlane.f32.xlu1 %v928_v24 }
 0x8c9   :  { %949 = vrot.lane.b32.xlu1 %v3786_v11, %s3685_s21 }
 0x8cd   :  { %1097 = vrot.lane.b32.xlu1 %v3469_v20, %s3686_s24 }
 0x8d1   :  { %3438 = vrot.lane.b32.xlu1 %v3437_v1, %s3671_s12 }
 0x93d   :  { %v927_v25 = vpop.xlane.xlu0 %926 }
 0x93e   :  { %v931_v28 = vsub.f32 %v923_v15, %v927_v25 }
 0x940   :  { %v933_v26 = vmul.f32 1.442695, %v931_v28 }
 0x942   :  { %3517 = vpow2.f32 %v933_v26 }
 0x945   :  { %v930_v27 = vpop.xlane.xlu1 %929 }
 0x946   :  { %v932_v29 = vsub.f32 %v924_v23, %v930_v27 }
 0x948   :  { %v935_v30 = vmul.f32 1.442695, %v932_v29 }
 0x949   :  { %v950_v11 = vpop.permute.xlu1 %949 }
 0x94a   :  { %3519 = vpow2.f32 %v935_v30  ;;  %v955_v31 = vsel %vm281_vm3, %v950_v11, 0  ;;  %v3997_v11 = vld [vmem:[#allocation5 + $0x4] ss:$0 sm:$0xff] }
 0x94b   :  { %3217 = vmatpush3.bf16.msra.mxu1 %v955_v31 }
 0x94c   :  { %v3518_v32 = vpop.eup %3517  ;;  %3228 = vmatprep.subr.bf16.mxu1 %v3673_v0 }
 0x94d   :  { %v937_v33 = vsel %vm153_vm2, %v3518_v32, 0.0  ;;  %v1098_v40 = vpop.permute.xlu1 %1097 }
 0x94e   :  { %938 = vadd.xlane.f32.xlu0 %v937_v33 }
 0x951   :  { %v3439_v58 = vpop.permute.xlu1 %3438 }
 0x952   :  { %v3441_v59 = vunpack.i.h.bf16 %v3439_v58  ;;  %v3440_v60 = vunpack.i.l.bf16 %v3439_v58 }
 0x954   :  { %v3520_v57 = vpop.eup %3519  ;;  %v1070_v8 = vsel %vm153_vm2, %v3856_v7, %v3441_v59  ;;  %v1069_v9 = vsel %vm153_vm2, %v3854_v63, %v3440_v60  ;;  %v2947_v7 = vld [vmem:[#allocation5 + $0x1] ss:$0 sm:$0xff]  ;;  %v58_v59 = vld [vmem:[%s4355_s1] sm:$0xff]  ;;  %v59_v60 = vld [vmem:[%s4355_s1 + $0x8] sm:$0xff] }
 0x955   :  { %v940_v61 = vsel %vm153_vm2, %v3520_v57, 0.0 }
 0x956   :  { %941 = vadd.xlane.f32.xlu0 %v940_v61 }
 0x96c   :  { %997 = vrot.lane.b32.xlu0 %v3790_v14, %s3685_s21 }
 0x970   :  { %3443 = vrot.lane.b32.xlu0 %v3442_v62, %s3687_s0 }
 0x974   :  { %1099 = vrot.lane.b32.xlu0 %v3470_v43, %s3686_s24 }
 0x978   :  { %1164 = vrot.lane.b32.xlu0 %v3472_v50, %s3675_s29 }
 0x9db   :  { %v939_v1 = vpop.xlane.xlu0 %938 }
 0x9dc   :  { %3521 = vrcp.f32 %v939_v1 }
 0x9e3   :  { %v942_v34 = vpop.xlane.xlu0 %941 }
 0x9e4   :  { %3523 = vrcp.f32 %v942_v34 }
 0x9e6   :  { %v3522_v35 = vpop.eup %3521 }
 0x9e7   :  { %v945_v36 = vmul.f32 %v3522_v35, %v3518_v32  ;;  %v998_v37 = vpop.permute.xlu0 %997 }
 0x9e8   :  { %v1003_v38 = vsel %vm281_vm3, %v998_v37, 0 }
 0x9e9   :  { %3223 = vmatpush3.bf16.msra.mxu0 %v1003_v38  ;;  %v947_v39 = vpack.c.bf16 %v945_v36, %v945_v36 }
 0x9ea   :  { %3236 = vmatprep.subr.bf16.mxu0 %v3673_v0 }
 0x9eb   :  { %3219 = vmatmul.mubr.msk.bf16.vlgmr.msra.gmra.mrb[36].mxu1 %vm153_vm2, %v947_v39  ;;  %v3444_v44 = vpop.permute.xlu0 %3443 }
 0x9ec   :  { %3229 = vmatpush3.bf16.msra.mxu1 %v1098_v40  ;;  %3232 = vmatprep.mubr.msk.bf16.mxu1 %vm3674_vm0, %v3673_v0  ;;  %v3446_v62 = vunpack.i.h.bf16 %v3444_v44  ;;  %v3445_v2 = vunpack.i.l.bf16 %v3444_v44 }
 0x9ed   :  { %3230 = vmatprep.subr.bf16.mxu1 %v3673_v0 }
 0x9ee   :  { %v3524_v14 = vpop.eup %3523  ;;  %v1073_v13 = vsel %vm1071_vm4, %v1070_v8, %v3446_v62  ;;  %v1072_v15 = vsel %vm1071_vm4, %v1069_v9, %v3445_v2  ;;  %v1407_v62 = vpack.c.bf16 %v59_v60, %v58_v59  ;;  %v4024_v2 = vld [vmem:[#allocation5 + $0x2] ss:$0 sm:$0xff]  ;;  %v4082_v60 = vld [vmem:[%s4357_s3 + $0x1] ss:$0 sm:$0xff] }
 0x9ef   :  { %v946_v41 = vmul.f32 %v3524_v14, %v3520_v57  ;;  %v1100_v46 = vpop.permute.xlu0 %1099 }
 0x9f0   :  { %3231 = vmatpush3.bf16.msra.mxu1 %v1100_v46 }
 0x9f1   :  { %v948_v42 = vpack.c.bf16 %v946_v41, %v946_v41  ;;  %3244 = vmatprep.subr.bf16.mxu1 %v3673_v0 }
 0x9f3   :  { %3225 = vmatmul.mubr.msk.bf16.vlgmr.msra.gmra.mrb[24].mxu0 %vm153_vm2, %v948_v42  ;;  %v1165_v63 = vpop.permute.xlu0 %1164 }
 0x9f4   :  { %3240 = vmatprep.mubr.msk.bf16.mxu0 %vm3674_vm0, %v3673_v0 }
 0xabe   :  { %v991_v45 = vpop.f32.mrb[36].mxu1 }
 0xabf   :  { %v3220_v47 = vpop.f32.mrb[37].mxu1 }
 0xac0   :  { %v994_v48 = vpop.f32.mrb[38].mxu1 }
 0xac1   :  { %v3221_v49 = vpop.f32.mrb[39].mxu1  ;;  %v3473_v48 = vld [vmem:[%s4358_s4 + $0x4] ss:$16 sps:$4 sm:$0xff]  }
 0xac6   :  { %v1039_v51 = vpop.f32.mrb[24].mxu0 }
 0xac7   :  { %v3447_v52 = vpack.i.bf16 %v1039_v51, %v991_v45  ;;  %v3226_v53 = vpop.f32.mrb[25].mxu0 }
 0xac8   :  { %v1042_v54 = vpop.f32.mrb[26].mxu0 }
 0xac9   :  { %v3227_v55 = vpop.f32.mrb[27].mxu0  ;;  %3448 = vrot.lane.b32.xlu1 %v3447_v52, %s3688_s28 }
 0xacd   :  { %1162 = vrot.lane.b32.xlu1 %v3471_v56, %s3675_s29 }
 0xb3b   :  { %v3449_v6 = vpop.permute.xlu1 %3448 }
 0xb3c   :  { %v3451_v10 = vunpack.i.h.bf16 %v3449_v6  ;;  %v3450_v12 = vunpack.i.l.bf16 %v3449_v6 }
 0xb3e   :  { %v1076_v16 = vsel %vm1074_vm5, %v1073_v13, %v3451_v10  ;;  %v1075_v17 = vsel %vm1074_vm5, %v1072_v15, %v3450_v12  ;;  %v60_v15 = vld [vmem:[%s4355_s1 + $0x10] sm:$0xff] }
 0xb3f   :  { %v1081_v18 = vpack.c.bf16 %v1076_v16, %v1075_v17  ;;  %v1163_v19 = vpop.permute.xlu1 %1162  ;;  %v61_v16 = vld [vmem:[%s4355_s1 + $0x18] sm:$0xff] }
 0xb40   :  { %3237 = vmatpush3.bf16.msra.mxu0 %v1163_v19  ;;  %v1408_v17 = vpack.c.bf16 %v61_v16, %v60_v15 }
 0xb41   :  { %3233 = vmatmul.mubr.msk.bf16.vlgmr.msra.gmra.mrb[40].mxu1 %vm88_vm1, %v1081_v18  ;;  %3238 = vmatprep.subr.bf16.mxu0 %v3673_v0 }
 0xb42   :  { %3245 = vmatpush3.bf16.msra.mxu1 %v3471_v56  ;;  %3248 = vmatprep.mubr.msk.bf16.mxu1 %vm3674_vm0, %v3673_v0 }
 0xb43   :  { %3246 = vmatprep.subr.bf16.mxu1 %v3673_v0 }
 0xb44   :  { %3239 = vmatpush3.bf16.msra.mxu0 %v1165_v63 }
 0xb45   :  { %3252 = vmatprep.subr.bf16.mxu0 %v3673_v0 }
 0xb46   :  { %3247 = vmatpush3.bf16.msra.mxu1 %v3472_v50 }
 0xb49   :  { %3249 = vmatmul.mubr.msk.bf16.vlgmr.msra.gmra.mrb[44].mxu1 %vm88_vm1, %v3779_v5 }
 0xb4a   :  { %3264 = vmatprep.mubr.msk.bf16.mxu1 %vm88_vm1, %v1407_v62 }
 0xc14   :  { %v1140_v21 = vpop.f32.mrb[40].mxu1 }
 0xc15   :  { %v3234_v22 = vpop.f32.mrb[41].mxu1  ;;  %v1141_v24 = vadd.f32 %v2947_v7, %v1140_v21 }
 0xc16   :  { %v1143_v23 = vpop.f32.mrb[42].mxu1 }
 0xc17   :  { %v1144_v20 = vadd.f32 %v2947_v7, %v1143_v23  ;;  %v3235_v25 = vpop.f32.mrb[43].mxu1 }
 0xc19   :  { %v1151_v28 = vpack.c.bf16 %v1144_v20, %v1141_v24 }
 0xc1b   :  { %3241 = vmatmul.mubr.msk.bf16.vlgmr.msra.gmra.mrb[28].mxu0 %vm88_vm1, %v1151_v28 }
 0xc1c   :  { %v1248_v26 = vpop.f32.mrb[44].mxu1  ;;  %3256 = vmatprep.mubr.msk.bf16.mxu0 %vm3674_vm0, %v3673_v0  ;;  %3253 = vmatpush3.bf16.msra.mxu0 %v3473_v48 }
 0xc1d   :  { %v3250_v27 = vpop.f32.mrb[45].mxu1  ;;  %3254 = vmatprep.subr.bf16.mxu0 %v3673_v0 }
 0xc1e   :  { %v1251_v5 = vpop.f32.mrb[46].mxu1 }
 0xc1f   :  { %v3251_v29 = vpop.f32.mrb[47].mxu1 }
 0xcee   :  { %v1205_v30 = vpop.f32.mrb[28].mxu0 }
 0xcef   :  { %v1249_v31 = vadd.f32 %v1248_v26, %v1205_v30  ;;  %v3242_v32 = vpop.f32.mrb[29].mxu0 }
 0xcf0   :  { %v1208_v33 = vpop.f32.mrb[30].mxu0 }
 0xcf1   :  { %v1260_v57 = vadd.f32 %v3997_v11, %v1249_v31  ;;  %v1252_v61 = vadd.f32 %v1251_v5, %v1208_v33  ;;  %v3243_v1 = vpop.f32.mrb[31].mxu0  ;;  %v2958_v5 = vld [vmem:[#allocation5 + $0x7] ss:$0 sm:$0xff]  ;;  %v2959_v33 = vld [vmem:[#allocation5 + $0x8] ss:$0 sm:$0xff] }
 0xcf3   :  { %v2956_v34 = vmul.f32 -1.442695, %v1260_v57  ;;  %v1261_v35 = vadd.f32 %v3997_v11, %v1252_v61 }
 0xcf5   :  { %3525 = vpow2.f32 %v2956_v34  ;;  %v2957_v36 = vmul.f32 -1.442695, %v1261_v35 }
 0xcf7   :  { %3527 = vpow2.f32 %v2957_v36 }
 0xcff   :  { %v3526_v37 = vpop.eup %3525 }
 0xd00   :  { %v1268_v38 = vadd.f32 1.0, %v3526_v37 }
 0xd01   :  { %v3528_v39 = vpop.eup %3527 }
 0xd02   :  { %3529 = vrcp.f32 %v1268_v38  ;;  %v1269_v40 = vadd.f32 1.0, %v3528_v39 }
 0xd04   :  { %3531 = vrcp.f32 %v1269_v40 }
 0xd0c   :  { %v3530_v14 = vpop.eup %3529 }
 0xd0d   :  { %v1274_v41 = vmul.f32 %v3530_v14, %v1141_v24 }
 0xd0e   :  { %v3532_v42 = vpop.eup %3531 }
 0xd0f   :  { %v1276_v43 = vadd.f32 %v1274_v41, %v3772_v3  ;;  %v1275_v44 = vmul.f32 %v3532_v42, %v1144_v20  ;;  %v3474_v3 = vld [vmem:[%s4358_s4 + $0x24] ss:$16 sps:$4 sm:$0xff]  }
 0xd10   :  { %3255 = vmatpush3.bf16.msra.mxu0 %v3474_v3 }
 0xd11   :  { %v1280_v45 = vsel %vm88_vm1, %v1276_v43, 0.0  ;;  %v1277_v46 = vadd.f32 %v1275_v44, %v3774_v4  ;;  %3268 = vmatprep.subr.bf16.mxu0 %v3673_v0 }
 0xd12   :  { %1281 = vadd.xlane.f32.xlu1 %v1280_v45 }
 0xd13   :  { %v1283_v47 = vsel %vm88_vm1, %v1277_v46, 0.0 }
 0xd14   :  { %1284 = vadd.xlane.f32.xlu0 %v1283_v47 }
 0xd9f   :  { %v1282_v49 = vpop.xlane.xlu1 %1281 }
 0xda0   :  { %v1287_v4 = vmul.f32 0.03125, %v1282_v49 }
 0xda1   :  { %v1285_v50 = vpop.xlane.xlu0 %1284 }
 0xda2   :  { %v1289_v51 = vsub.f32 %v1276_v43, %v1287_v4  ;;  %v1288_v52 = vmul.f32 0.03125, %v1285_v50 }
 0xda4   :  { %v1290_v53 = vsub.f32 %v1277_v46, %v1288_v52  ;;  %v1291_v54 = vmul.f32 %v1289_v51, %v1289_v51 }
 0xda6   :  { %v1293_v55 = vsel %vm88_vm1, %v1291_v54, 0.0  ;;  %v1292_v56 = vmul.f32 %v1290_v53, %v1290_v53  ;;  %v4077_v54 = vld [vmem:[%s4357_s3] ss:$0 sm:$0xff] }
 0xda7   :  { %1294 = vadd.xlane.f32.xlu0 %v1293_v55 }
 0xda8   :  { %v1296_v58 = vsel %vm88_vm1, %v1292_v56, 0.0 }
 0xda9   :  { %1297 = vadd.xlane.f32.xlu1 %v1296_v58 }
 0xdba   :  { %1411 = vrot.lane.b32.xlu1 %v3474_v3, %s3675_s29 }
 0xdbd   :  { %1409 = vrot.lane.b32.xlu0 %v3473_v48, %s3675_s29 }
 0xdbe   :  { %1416 = vrot.lane.b32.xlu1 %v4024_v2, %s3675_s29 }
 0xe34   :  { %v1295_v6 = vpop.xlane.xlu0 %1294 }
 0xe35   :  { %v1299_v8 = vmul.f32 0.032258064, %v1295_v6 }
 0xe36   :  { %v1298_v9 = vpop.xlane.xlu1 %1297 }
 0xe37   :  { %3533 = vrsqrt.f32 %v1299_v8  ;;  %v1300_v10 = vmul.f32 0.032258064, %v1298_v9  ;;  %vm1303_vm6 = vcmp.eq.f32.partialorder %v1299_v8, inf  ;;  %v1306_v63 = vand.u32 2147483648, %v1299_v8 }
 0xe38   :  { %v1410_v12 = vpop.permute.xlu0 %1409  ;;  %vm1305_vm7 = vcmp.eq.f32.partialorder %v1299_v8, 0.0 }
 0xe39   :  { %3260 = vmatprep.subr.bf16.mxu1 %v1410_v12  ;;  %3535 = vrsqrt.f32 %v1300_v10  ;;  %vm1310_vm8 = vcmp.eq.f32.partialorder %v1300_v10, inf  ;;  %v1313_v20 = vand.u32 2147483648, %v1300_v10  ;;  %vm1312_vm9 = vcmp.eq.f32.partialorder %v1300_v10, 0.0 }
 0xe3a   :  { %3261 = vmatpush3.bf16.msra.mxu1 %v1410_v12  ;;  %v1412_v13 = vpop.permute.xlu1 %1411 }
 0xe3b   :  { %3262 = vmatprep.subr.bf16.mxu1 %v1412_v13 }
 0xe3e   :  { %3263 = vmatpush3.bf16.msra.mxu1 %v1412_v13  ;;  %v1417_v35 = vpop.permute.xlu1 %1416 }
 0xe3f   :  { %3274 = vmatprep.subr.bf16.mxu1 %v3673_v0 }
 0xe41   :  { %v3534_v18 = vpop.eup %3533  ;;  %3265 = vmatmul.mubr.msk.bf16.vlgmr.msra.gmra.mrb[48].mxu1 %vm88_vm1, %v1408_v17 }
 0xe42   :  { %v1302_v19 = vmul.f32 %v3534_v18, %v1299_v8  ;;  %3276 = vmatprep.mubr.msk.bf16.mxu1 %vm3674_vm0, %v3673_v0 }
 0xe43   :  { %v3536_v7 = vpop.eup %3535 }
 0xe44   :  { %v1304_v21 = vsel %vm1303_vm6, %v1299_v8, %v1302_v19  ;;  %v1309_v23 = vmul.f32 %v3536_v7, %v1300_v10 }
 0xe45   :  { %v1307_v22 = vsel %vm1305_vm7, %v1306_v63, %v1304_v21 }
 0xe46   :  { %v1315_v24 = vadd.f32 1e-06, %v1307_v22  ;;  %v1311_v25 = vsel %vm1310_vm8, %v1300_v10, %v1309_v23 }
 0xe47   :  { %v1314_v28 = vsel %vm1312_vm9, %v1313_v20, %v1311_v25 }
 0xe48   :  { %3537 = vrcp.f32 %v1315_v24  ;;  %v1316_v26 = vadd.f32 1e-06, %v1314_v28 }
 0xe4a   :  { %3539 = vrcp.f32 %v1316_v26 }
 0xe52   :  { %v3538_v27 = vpop.eup %3537 }
 0xe53   :  { %v1321_v29 = vmul.f32 %v3538_v27, %v1289_v51 }
 0xe54   :  { %v3540_v30 = vpop.eup %3539 }
 0xe55   :  { %v1322_v31 = vmul.f32 %v3540_v30, %v1290_v53  ;;  %v1327_v32 = vmul.f32 %v2958_v5, %v1321_v29 }
 0xe57   :  { %v1328_v57 = vmul.f32 %v2958_v5, %v1322_v31  ;;  %v4038_v61 = vadd.f32 %v2959_v33, %v1327_v32 }
 0xe59   :  { %v4040_v1 = vadd.f32 %v2959_v33, %v1328_v57 }
 0xe5b   :  { %v4044_v34 = vpack.c.bf16 %v4040_v1, %v4038_v61 }
 0xe5d   :  { %3257 = vmatmul.mubr.msk.bf16.vlgmr.msra.gmra.mrb[32].mxu0 %vm88_vm1, %v4044_v34 }
 0xe5e   :  { %3270 = vmatprep.mubr.msk.bf16.mxu0 %vm3674_vm0, %v3673_v0 }
 0xf14   :  { %v3266_v36 = vpop.f32.mrb[48].mxu1 }
 0xf15   :  { %v1459_v37 = vpop.f32.mrb[49].mxu1  ;;  %v1468_v38 = vadd.f32 %v3266_v36, %v1417_v35 }
 0xf16   :  { %v3267_v39 = vpop.f32.mrb[50].mxu1  ;;  %v1460_v40 = vadd.f32 %v1459_v37, %v1417_v35 }
 0xf17   :  { %v1471_v14 = vadd.f32 %v3267_v39, %v1417_v35  ;;  %v1462_v41 = vpop.f32.mrb[51].mxu1 }
 0xf18   :  { %v1463_v42 = vadd.f32 %v1462_v41, %v1417_v35 }
 0xf19   :  { %v4050_v43 = vpack.c.bf16 %v1471_v14, %v1468_v38 }
 0xf1a   :  { %v4052_v44 = vpack.c.bf16 %v1463_v42, %v1460_v40 }
 0xf1b   :  { %v1538_v45 = vsel %vm153_vm2, %v4050_v43, 0 }
 0xf1c   :  { %v1492_v46 = vsel %vm153_vm2, %v4052_v44, 0  ;;  %3275 = vmatpush3.bf16.xpose.msra.mxu1 %v1538_v45 }
 0xf1d   :  { %3269 = vmatpush3.bf16.xpose.msra.mxu0 %v1492_v46  ;;  %3286 = vmatprep.subr.bf16.mxu1 %v3673_v0 }
 0xf1e   :  { %3280 = vmatprep.subr.bf16.mxu0 %v3673_v0 }
 0xf30   :  { %v1394_v47 = vpop.f32.mrb[32].mxu0 }
 0xf31   :  { %v1395_v48 = vadd.f32 %v4024_v2, %v1394_v47  ;;  %v3258_v3 = vpop.f32.mrb[33].mxu0 }
 0xf32   :  { %v1397_v49 = vpop.f32.mrb[34].mxu0 }
 0xf33   :  { %v4061_v4 = vpack.c.bf16 %v1395_v48, %v1395_v48  ;;  %v1398_v50 = vadd.f32 %v4024_v2, %v1397_v49  ;;  %v3259_v51 = vpop.f32.mrb[35].mxu0 }
 0xf35   :  { %v4064_v52 = vpack.c.bf16 %v1398_v50, %v1398_v50  ;;  %3271 = vmatmul.mubr.msk.bf16.vlgmr.msra.gmra.mrb[36].mxu0 %vm153_vm2, %v4061_v4 }
 0xf36   :  { %3282 = vmatprep.mubr.msk.bf16.mxu0 %vm3674_vm0, %v3673_v0 }
 0xf37   :  { %3277 = vmatmul.mubr.msk.bf16.vlgmr.msra.gmra.mrb[52].mxu1 %vm153_vm2, %v4064_v52 }
 0xf38   :  { %3288 = vmatprep.mubr.msk.bf16.mxu1 %vm3674_vm0, %v3673_v0 }
0x1008   :  { %v1528_v53 = vpop.f32.mrb[36].mxu0 }
0x1009   :  { %v1580_v55 = vmul.f32 0.35355338, %v1528_v53  ;;  %v3272_v56 = vpop.f32.mrb[37].mxu0 }
0x100a   :  { %v1531_v58 = vpop.f32.mrb[38].mxu0  ;;  %v1574_v59 = vpop.f32.mrb[52].mxu1 }
0x100b   :  { %v1581_v62 = vmul.f32 0.35355338, %v1574_v59  ;;  %v3273_v2 = vpop.f32.mrb[39].mxu0  ;;  %v3278_v6 = vpop.f32.mrb[53].mxu1  ;;  %v1582_v8 = vadd.f32 %v4077_v54, %v1580_v55 }
0x100c   :  { %v1577_v9 = vpop.f32.mrb[54].mxu1 }
0x100d   :  { %v3279_v10 = vpop.f32.mrb[55].mxu1  ;;  %v1584_v12 = vsel %vm1071_vm4, %v1582_v8, -inf  ;;  %v1583_v13 = vadd.f32 %v4082_v60, %v1581_v62 }
0x100e   :  { %1585 = vmax.xlane.f32.xlu0 %v1584_v12 }
0x100f   :  { %v1587_v15 = vsel %vm1071_vm4, %v1583_v13, -inf }
0x1010   :  { %1588 = vmax.xlane.f32.xlu1 %v1587_v15 }
0x1021   :  { %1609 = vrot.lane.b32.xlu1 %v4052_v44, %s3675_s29 }
0x1025   :  { %1704 = vrot.lane.b32.xlu1 %v4052_v44, %s3678_s2 }
0x1029   :  { %1754 = vrot.lane.b32.xlu1 %v4050_v43, %s3678_s2 }
0x102d   :  { %1752 = vrot.lane.b32.xlu1 %v4064_v52, %s3678_s2 }
0x109b   :  { %v1586_v16 = vpop.xlane.xlu0 %1585 }
0x109c   :  { %v1590_v17 = vsub.f32 %v1582_v8, %v1586_v16 }
0x109d   :  { %v1589_v18 = vpop.xlane.xlu1 %1588 }
0x109e   :  { %v1592_v19 = vmul.f32 1.442695, %v1590_v17  ;;  %v1591_v63 = vsub.f32 %v1583_v13, %v1589_v18 }
0x10a0   :  { %3541 = vpow2.f32 %v1592_v19  ;;  %v1594_v7 = vmul.f32 1.442695, %v1591_v63 }
0x10a1   :  { %v1610_v21 = vpop.permute.xlu1 %1609 }
0x10a2   :  { %3543 = vpow2.f32 %v1594_v7  ;;  %3281 = vmatpush3.bf16.msra.mxu0 %v1610_v21 }
0x10a3   :  { %3292 = vmatprep.subr.bf16.mxu0 %v3673_v0 }
0x10a5   :  { %v1705_v5 = vpop.permute.xlu1 %1704 }
0x10a6   :  { %v1710_v32 = vsel %vm153_vm2, %v1705_v5, 0 }
0x10a9   :  { %v1755_v57 = vpop.permute.xlu1 %1754 }
0x10aa   :  { %v3542_v22 = vpop.eup %3541  ;;  %v1760_v36 = vsel %vm153_vm2, %v1755_v57, 0 }
0x10ab   :  { %v1596_v23 = vsel %vm1071_vm4, %v3542_v22, 0.0 }
0x10ac   :  { %v3544_v24 = vpop.eup %3543  ;;  %1597 = vadd.xlane.f32.xlu0 %v1596_v23 }
0x10ad   :  { %v1599_v20 = vsel %vm1071_vm4, %v3544_v24, 0.0  ;;  %v1753_v38 = vpop.permute.xlu1 %1752 }
0x10b0   :  { %1600 = vadd.xlane.f32.xlu0 %v1599_v20 }
0x10c6   :  { %1656 = vrot.lane.b32.xlu0 %v4050_v43, %s3675_s29 }
0x10ca   :  { %1702 = vrot.lane.b32.xlu0 %v4061_v4, %s3678_s2 }
0x1139   :  { %v1598_v25 = vpop.xlane.xlu0 %1597 }
0x113a   :  { %3545 = vrcp.f32 %v1598_v25 }
0x113d   :  { %v1601_v28 = vpop.xlane.xlu0 %1600 }
0x113e   :  { %3547 = vrcp.f32 %v1601_v28 }
0x1141   :  { %v1657_v26 = vpop.permute.xlu0 %1656 }
0x1142   :  { %3287 = vmatpush3.bf16.msra.mxu1 %v1657_v26 }
0x1143   :  { %3298 = vmatprep.subr.bf16.mxu1 %v3673_v0 }
0x1144   :  { %v3546_v27 = vpop.eup %3545 }
0x1145   :  { %v1604_v29 = vmul.f32 %v3546_v27, %v3542_v22  ;;  %v1703_v37 = vpop.permute.xlu0 %1702 }
0x1147   :  { %v1606_v30 = vpack.c.bf16 %v1604_v29, %v1604_v29 }
0x1148   :  { %v3548_v31 = vpop.eup %3547 }
0x1149   :  { %v1605_v33 = vmul.f32 %v3548_v31, %v3544_v24  ;;  %3283 = vmatmul.mubr.msk.bf16.vlgmr.msra.gmra.mrb[40].mxu0 %vm1071_vm4, %v1606_v30 }
0x114a   :  { %3293 = vmatpush3.bf16.xpose.msra.mxu0 %v1710_v32  ;;  %3294 = vmatprep.mubr.msk.bf16.mxu0 %vm3674_vm0, %v3673_v0 }
0x114b   :  { %v1607_v35 = vpack.c.bf16 %v1605_v33, %v1605_v33  ;;  %3304 = vmatprep.subr.bf16.mxu0 %v3673_v0 }
0x114d   :  { %3289 = vmatmul.mubr.msk.bf16.vlgmr.msra.gmra.mrb[56].mxu1 %vm1071_vm4, %v1607_v35 }
0x114e   :  { %3299 = vmatpush3.bf16.xpose.msra.mxu1 %v1760_v36  ;;  %3300 = vmatprep.mubr.msk.bf16.mxu1 %vm3674_vm0, %v3673_v0 }
0x114f   :  { %3310 = vmatprep.subr.bf16.mxu1 %v3673_v0 }
0x1151   :  { %3295 = vmatmul.mubr.msk.bf16.vlgmr.msra.gmra.mrb[44].mxu0 %vm153_vm2, %v1703_v37 }
0x1152   :  { %3306 = vmatprep.mubr.msk.bf16.mxu0 %vm3674_vm0, %v3673_v0 }
0x1155   :  { %3301 = vmatmul.mubr.msk.bf16.vlgmr.msra.gmra.mrb[60].mxu1 %vm153_vm2, %v1753_v38 }
0x1156   :  { %3312 = vmatprep.mubr.msk.bf16.mxu1 %vm3674_vm0, %v3673_v0 }
0x121c   :  { %v4120_v39 = vpop.f32.mrb[40].mxu0 }
0x121d   :  { %v3284_v40 = vpop.f32.mrb[41].mxu0 }
0x121e   :  { %v1652_v14 = vpop.f32.mrb[42].mxu0 }
0x121f   :  { %v3285_v41 = vpop.f32.mrb[43].mxu0 }
0x1220   :  { %v4122_v42 = vpop.f32.mrb[56].mxu1 }
0x1221   :  { %v3290_v45 = vpop.f32.mrb[57].mxu1 }
0x1222   :  { %v1699_v46 = vpop.f32.mrb[58].mxu1 }
0x1223   :  { %v3291_v47 = vpop.f32.mrb[59].mxu1 }
0x1224   :  { %v1746_v48 = vpop.f32.mrb[44].mxu0 }
0x1225   :  { %v1802_v3 = vmul.f32 0.35355338, %v1746_v48  ;;  %v3296_v49 = vpop.f32.mrb[45].mxu0 }
0x1226   :  { %v1749_v50 = vpop.f32.mrb[46].mxu0 }
0x1227   :  { %v3297_v51 = vpop.f32.mrb[47].mxu0  ;;  %v1804_v53 = vadd.f32 %v4077_v54, %v1802_v3 }
0x1228   :  { %v1796_v55 = vpop.f32.mrb[60].mxu1 }
0x1229   :  { %v1803_v56 = vmul.f32 0.35355338, %v1796_v55  ;;  %v3302_v58 = vpop.f32.mrb[61].mxu1  ;;  %v1806_v59 = vsel %vm1071_vm4, %v1804_v53, -inf }
0x122a   :  { %v1799_v62 = vpop.f32.mrb[62].mxu1  ;;  %1807 = vmax.xlane.f32.xlu0 %v1806_v59 }
0x122b   :  { %v3303_v2 = vpop.f32.mrb[63].mxu1  ;;  %v1805_v6 = vadd.f32 %v4082_v60, %v1803_v56 }
0x122d   :  { %v1809_v8 = vsel %vm1071_vm4, %v1805_v6, -inf }
0x122e   :  { %1810 = vmax.xlane.f32.xlu1 %v1809_v8 }
0x123f   :  { %1830 = vrot.lane.b32.xlu1 %v4052_v44, %s3677_s14 }
0x1243   :  { %1924 = vrot.lane.b32.xlu1 %v4052_v44, %s3681_s17 }
0x1247   :  { %1974 = vrot.lane.b32.xlu1 %v4050_v43, %s3681_s17 }
0x124b   :  { %1972 = vrot.lane.b32.xlu1 %v4064_v52, %s3681_s17 }
0x12b7   :  { %v1808_v9 = vpop.xlane.xlu0 %1807 }
0x12b8   :  { %v1812_v10 = vsub.f32 %v1804_v53, %v1808_v9 }
0x12ba   :  { %v1814_v12 = vmul.f32 1.442695, %v1812_v10 }
0x12bb   :  { %v1811_v13 = vpop.xlane.xlu1 %1810 }
0x12bc   :  { %3549 = vpow2.f32 %v1814_v12  ;;  %v1813_v15 = vsub.f32 %v1805_v6, %v1811_v13 }
0x12be   :  { %v1816_v16 = vmul.f32 1.442695, %v1813_v15 }
0x12bf   :  { %v1831_v17 = vpop.permute.xlu1 %1830 }
0x12c0   :  { %3551 = vpow2.f32 %v1816_v16  ;;  %3305 = vmatpush3.bf16.msra.mxu0 %v1831_v17 }
0x12c1   :  { %3316 = vmatprep.subr.bf16.mxu0 %v3673_v0 }
0x12c3   :  { %v1925_v20 = vpop.permute.xlu1 %1924 }
0x12c4   :  { %v1930_v27 = vsel %vm153_vm2, %v1925_v20, 0 }
0x12c6   :  { %v3550_v18 = vpop.eup %3549 }
0x12c7   :  { %v1818_v19 = vsel %vm1071_vm4, %v3550_v18, 0.0  ;;  %v1975_v29 = vpop.permute.xlu1 %1974 }
0x12c8   :  { %1819 = vadd.xlane.f32.xlu0 %v1818_v19  ;;  %v1980_v31 = vsel %vm153_vm2, %v1975_v29, 0 }
0x12ca   :  { %v3552_v63 = vpop.eup %3551 }
0x12cb   :  { %v1821_v7 = vsel %vm1071_vm4, %v3552_v63, 0.0  ;;  %v1973_v33 = vpop.permute.xlu1 %1972 }
0x12cc   :  { %1822 = vadd.xlane.f32.xlu0 %v1821_v7 }
0x12e2   :  { %1876 = vrot.lane.b32.xlu0 %v4050_v43, %s3677_s14 }
0x12e6   :  { %1922 = vrot.lane.b32.xlu0 %v4061_v4, %s3681_s17 }
0x1355   :  { %v1820_v21 = vpop.xlane.xlu0 %1819 }
0x1356   :  { %3553 = vrcp.f32 %v1820_v21 }
0x1359   :  { %v1823_v22 = vpop.xlane.xlu0 %1822 }
0x135a   :  { %3555 = vrcp.f32 %v1823_v22 }
0x135d   :  { %v1877_v23 = vpop.permute.xlu0 %1876 }
0x135e   :  { %3311 = vmatpush3.bf16.msra.mxu1 %v1877_v23 }
0x135f   :  { %3322 = vmatprep.subr.bf16.mxu1 %v3673_v0 }
0x1360   :  { %v3554_v24 = vpop.eup %3553 }
0x1361   :  { %v1826_v25 = vmul.f32 %v3554_v24, %v3550_v18  ;;  %v1923_v32 = vpop.permute.xlu0 %1922 }
0x1363   :  { %v1828_v28 = vpack.c.bf16 %v1826_v25, %v1826_v25 }
0x1364   :  { %v3556_v26 = vpop.eup %3555 }
0x1365   :  { %v1827_v5 = vmul.f32 %v3556_v26, %v3552_v63  ;;  %3307 = vmatmul.mubr.msk.bf16.vlgmr.msra.gmra.mrb[48].mxu0 %vm1071_vm4, %v1828_v28 }
0x1366   :  { %3317 = vmatpush3.bf16.xpose.msra.mxu0 %v1930_v27  ;;  %3318 = vmatprep.mubr.msk.bf16.mxu0 %vm3674_vm0, %v3673_v0 }
0x1367   :  { %v1829_v30 = vpack.c.bf16 %v1827_v5, %v1827_v5  ;;  %3328 = vmatprep.subr.bf16.mxu0 %v3673_v0 }
0x1369   :  { %3313 = vmatmul.mubr.msk.bf16.vlgmr.msra.gmra.mrb[64].mxu1 %vm1071_vm4, %v1829_v30 }
0x136a   :  { %3323 = vmatpush3.bf16.xpose.msra.mxu1 %v1980_v31  ;;  %3324 = vmatprep.mubr.msk.bf16.mxu1 %vm3674_vm0, %v3673_v0 }
0x136b   :  { %3334 = vmatprep.subr.bf16.mxu1 %v3673_v0 }
0x136d   :  { %3319 = vmatmul.mubr.msk.bf16.vlgmr.msra.gmra.mrb[52].mxu0 %vm153_vm2, %v1923_v32 }
0x136e   :  { %3330 = vmatprep.mubr.msk.bf16.mxu0 %vm3674_vm0, %v3673_v0 }
0x1371   :  { %3325 = vmatmul.mubr.msk.bf16.vlgmr.msra.gmra.mrb[68].mxu1 %vm153_vm2, %v1973_v33 }
0x1372   :  { %3336 = vmatprep.mubr.msk.bf16.mxu1 %vm3674_vm0, %v3673_v0 }
0x1438   :  { %v4160_v57 = vpop.f32.mrb[48].mxu0 }
0x1439   :  { %v3308_v35 = vpop.f32.mrb[49].mxu0 }
0x143a   :  { %v1873_v36 = vpop.f32.mrb[50].mxu0 }
0x143b   :  { %v3309_v37 = vpop.f32.mrb[51].mxu0 }
0x143c   :  { %v4162_v38 = vpop.f32.mrb[64].mxu1 }
0x143d   :  { %v3452_v40 = vpack.i.bf16 %v4162_v38, %v4160_v57  ;;  %v3314_v14 = vpop.f32.mrb[65].mxu1 }
0x143e   :  { %v1919_v41 = vpop.f32.mrb[66].mxu1 }
0x143f   :  { %v3315_v45 = vpop.f32.mrb[67].mxu1 }
0x1440   :  { %v1966_v46 = vpop.f32.mrb[52].mxu0 }
0x1441   :  { %v2022_v47 = vmul.f32 0.35355338, %v1966_v46  ;;  %v3320_v48 = vpop.f32.mrb[53].mxu0 }
0x1442   :  { %v1969_v3 = vpop.f32.mrb[54].mxu0 }
0x1443   :  { %v3321_v49 = vpop.f32.mrb[55].mxu0  ;;  %v2024_v50 = vadd.f32 %v4077_v54, %v2022_v47 }
0x1444   :  { %v2016_v51 = vpop.f32.mrb[68].mxu1 }
0x1445   :  { %v2023_v53 = vmul.f32 0.35355338, %v2016_v51  ;;  %v3326_v55 = vpop.f32.mrb[69].mxu1  ;;  %v2026_v56 = vsel %vm1071_vm4, %v2024_v50, -inf }
0x1446   :  { %v2019_v58 = vpop.f32.mrb[70].mxu1  ;;  %2027 = vmax.xlane.f32.xlu0 %v2026_v56 }
0x1447   :  { %v3327_v59 = vpop.f32.mrb[71].mxu1  ;;  %v2025_v62 = vadd.f32 %v4082_v60, %v2023_v53 }
0x1449   :  { %v2029_v2 = vsel %vm1071_vm4, %v2025_v62, -inf }
0x144a   :  { %2030 = vmax.xlane.f32.xlu1 %v2029_v2 }
0x145b   :  { %2050 = vrot.lane.b32.xlu1 %v4052_v44, %s3680_s16 }
0x145f   :  { %2144 = vrot.lane.b32.xlu1 %v4052_v44, %s3684_s20 }
0x1463   :  { %2194 = vrot.lane.b32.xlu1 %v4050_v43, %s3684_s20 }
0x1467   :  { %2192 = vrot.lane.b32.xlu1 %v4064_v52, %s3684_s20 }
0x14d3   :  { %v2028_v6 = vpop.xlane.xlu0 %2027 }
0x14d4   :  { %v2032_v8 = vsub.f32 %v2024_v50, %v2028_v6 }
0x14d6   :  { %v2034_v9 = vmul.f32 1.442695, %v2032_v8 }
0x14d7   :  { %v2031_v10 = vpop.xlane.xlu1 %2030 }
0x14d8   :  { %3557 = vpow2.f32 %v2034_v9  ;;  %v2033_v12 = vsub.f32 %v2025_v62, %v2031_v10 }
0x14da   :  { %v2036_v13 = vmul.f32 1.442695, %v2033_v12 }
0x14db   :  { %v2051_v15 = vpop.permute.xlu1 %2050 }
0x14dc   :  { %3559 = vpow2.f32 %v2036_v13  ;;  %3329 = vmatpush3.bf16.msra.mxu0 %v2051_v15 }
0x14dd   :  { %3340 = vmatprep.subr.bf16.mxu0 %v3673_v0 }
0x14df   :  { %v2145_v22 = vpop.permute.xlu1 %2144 }
0x14e0   :  { %v2150_v25 = vsel %vm153_vm2, %v2145_v22, 0 }
0x14e2   :  { %v3558_v16 = vpop.eup %3557 }
0x14e3   :  { %v2038_v17 = vsel %vm1071_vm4, %v3558_v16, 0.0  ;;  %v2195_v26 = vpop.permute.xlu1 %2194 }
0x14e4   :  { %2039 = vadd.xlane.f32.xlu0 %v2038_v17  ;;  %v2200_v27 = vsel %vm153_vm2, %v2195_v26, 0 }
0x14e6   :  { %v3560_v18 = vpop.eup %3559 }
0x14e7   :  { %v2041_v19 = vsel %vm1071_vm4, %v3560_v18, 0.0  ;;  %v2193_v29 = vpop.permute.xlu1 %2192 }
0x14e8   :  { %2042 = vadd.xlane.f32.xlu0 %v2041_v19 }
0x14fe   :  { %2096 = vrot.lane.b32.xlu0 %v4050_v43, %s3680_s16 }
0x1502   :  { %2142 = vrot.lane.b32.xlu0 %v4061_v4, %s3684_s20 }
0x1571   :  { %v2040_v52 = vpop.xlane.xlu0 %2039 }
0x1572   :  { %3561 = vrcp.f32 %v2040_v52 }
0x1575   :  { %v2043_v63 = vpop.xlane.xlu0 %2042 }
0x1576   :  { %3563 = vrcp.f32 %v2043_v63 }
0x1579   :  { %v2097_v7 = vpop.permute.xlu0 %2096 }
0x157a   :  { %3335 = vmatpush3.bf16.msra.mxu1 %v2097_v7 }
0x157b   :  { %3346 = vmatprep.subr.bf16.mxu1 %v3673_v0 }
0x157c   :  { %v3562_v21 = vpop.eup %3561 }
0x157d   :  { %v2046_v23 = vmul.f32 %v3562_v21, %v3558_v16  ;;  %v2143_v5 = vpop.permute.xlu0 %2142  ;;  %v3476_v21 = vld [vmem:[%s4358_s4 + $0x24] ss:$16 sps:$4 sm:$0xff]  }
0x157f   :  { %v2048_v24 = vpack.c.bf16 %v2046_v23, %v2046_v23 }
0x1580   :  { %v3564_v20 = vpop.eup %3563 }
0x1581   :  { %v2047_v28 = vmul.f32 %v3564_v20, %v3560_v18  ;;  %3331 = vmatmul.mubr.msk.bf16.vlgmr.msra.gmra.mrb[56].mxu0 %vm1071_vm4, %v2048_v24 }
0x1582   :  { %3341 = vmatpush3.bf16.xpose.msra.mxu0 %v2150_v25  ;;  %3342 = vmatprep.mubr.msk.bf16.mxu0 %vm3674_vm0, %v3673_v0  ;;  %v3478_v25 = vld [vmem:[%s4358_s4 + $0x28] ss:$16 sps:$4 sm:$0xff]  }
0x1583   :  { %v2049_v4 = vpack.c.bf16 %v2047_v28, %v2047_v28  ;;  %3352 = vmatprep.subr.bf16.mxu0 %v3673_v0 }
0x1585   :  { %3337 = vmatmul.mubr.msk.bf16.vlgmr.msra.gmra.mrb[72].mxu1 %vm1071_vm4, %v2049_v4 }
0x1586   :  { %3347 = vmatpush3.bf16.xpose.msra.mxu1 %v2200_v27  ;;  %3348 = vmatprep.mubr.msk.bf16.mxu1 %vm3674_vm0, %v3673_v0 }
0x1587   :  { %3358 = vmatprep.subr.bf16.mxu1 %v3673_v0 }
0x1589   :  { %3343 = vmatmul.mubr.msk.bf16.vlgmr.msra.gmra.mrb[60].mxu0 %vm153_vm2, %v2143_v5 }
0x158a   :  { %3354 = vmatprep.mubr.msk.bf16.mxu0 %vm3674_vm0, %v3673_v0 }
0x158d   :  { %3349 = vmatmul.mubr.msk.bf16.vlgmr.msra.gmra.mrb[76].mxu1 %vm153_vm2, %v2193_v29 }
0x158e   :  { %3360 = vmatprep.mubr.msk.bf16.mxu1 %vm3674_vm0, %v3673_v0 }
0x1654   :  { %v2090_v30 = vpop.f32.mrb[56].mxu0 }
0x1655   :  { %v3332_v31 = vpop.f32.mrb[57].mxu0 }
0x1656   :  { %v2093_v32 = vpop.f32.mrb[58].mxu0  ;;  %v3477_v31 = vld [vmem:[%s4358_s4 + $0x8] ss:$16 sps:$4 sm:$0xff]  }
0x1657   :  { %v3333_v33 = vpop.f32.mrb[59].mxu0 }
0x1658   :  { %v2136_v35 = vpop.f32.mrb[72].mxu1 }
0x1659   :  { %v3457_v36 = vpack.i.bf16 %v2136_v35, %v2090_v30  ;;  %v3338_v37 = vpop.f32.mrb[73].mxu1 }
0x165a   :  { %v2139_v14 = vpop.f32.mrb[74].mxu1 }
0x165b   :  { %v3339_v41 = vpop.f32.mrb[75].mxu1 }
0x165c   :  { %v2186_v45 = vpop.f32.mrb[60].mxu0 }
0x165d   :  { %v2242_v46 = vmul.f32 0.35355338, %v2186_v45  ;;  %v3344_v47 = vpop.f32.mrb[61].mxu0 }
0x165e   :  { %v2189_v48 = vpop.f32.mrb[62].mxu0 }
0x165f   :  { %v3345_v3 = vpop.f32.mrb[63].mxu0  ;;  %v2244_v49 = vadd.f32 %v4077_v54, %v2242_v46  ;;  %v3475_v54 = vld [vmem:[%s4358_s4 + $0x4] ss:$16 sps:$4 sm:$0xff]  }
0x1660   :  { %v2236_v50 = vpop.f32.mrb[76].mxu1 }
0x1661   :  { %v2243_v51 = vmul.f32 0.35355338, %v2236_v50  ;;  %v3350_v53 = vpop.f32.mrb[77].mxu1  ;;  %v2246_v55 = vsel %vm1071_vm4, %v2244_v49, -inf }
0x1662   :  { %v2239_v56 = vpop.f32.mrb[78].mxu1  ;;  %2247 = vmax.xlane.f32.xlu0 %v2246_v55 }
0x1663   :  { %v3351_v58 = vpop.f32.mrb[79].mxu1  ;;  %v2245_v59 = vadd.f32 %v4082_v60, %v2243_v51 }
0x1665   :  { %v2249_v62 = vsel %vm1071_vm4, %v2245_v59, -inf }
0x1666   :  { %2250 = vmax.xlane.f32.xlu1 %v2249_v62 }
0x1677   :  { %2270 = vrot.lane.b32.xlu1 %v4052_v44, %s3683_s19 }
0x167b   :  { %2412 = vrot.lane.b32.xlu1 %v3475_v54, %s3686_s24 }
0x167f   :  { %3453 = vrot.lane.b32.xlu1 %v3452_v40, %s3671_s12 }
0x16ef   :  { %v2248_v2 = vpop.xlane.xlu0 %2247 }
0x16f0   :  { %v2252_v6 = vsub.f32 %v2244_v49, %v2248_v2 }
0x16f2   :  { %v2254_v60 = vmul.f32 1.442695, %v2252_v6 }
0x16f3   :  { %v2251_v8 = vpop.xlane.xlu1 %2250 }
0x16f4   :  { %3565 = vpow2.f32 %v2254_v60  ;;  %v2253_v9 = vsub.f32 %v2245_v59, %v2251_v8 }
0x16f6   :  { %v2256_v10 = vmul.f32 1.442695, %v2253_v9 }
0x16f7   :  { %v2271_v12 = vpop.permute.xlu1 %2270 }
0x16f8   :  { %3567 = vpow2.f32 %v2256_v10  ;;  %3353 = vmatpush3.bf16.msra.mxu0 %v2271_v12 }
0x16f9   :  { %3364 = vmatprep.subr.bf16.mxu0 %v3673_v0 }
0x16fb   :  { %v2413_v63 = vpop.permute.xlu1 %2412 }
0x16fe   :  { %v3566_v44 = vpop.eup %3565 }
0x16ff   :  { %v2258_v13 = vsel %vm1071_vm4, %v3566_v44, 0.0  ;;  %v3454_v32 = vpop.permute.xlu1 %3453 }
0x1700   :  { %2259 = vadd.xlane.f32.xlu0 %v2258_v13  ;;  %v3456_v33 = vunpack.i.h.bf16 %v3454_v32  ;;  %v3455_v35 = vunpack.i.l.bf16 %v3454_v32  ;;  %v3482_v32 = vld [vmem:[%s4358_s4 + $0x28] ss:$16 sps:$4 sm:$0xff]  }
0x1702   :  { %v3568_v15 = vpop.eup %3567  ;;  %v2387_v41 = vsel %vm153_vm2, %v4122_v42, %v3456_v33  ;;  %v2386_v45 = vsel %vm153_vm2, %v4120_v39, %v3455_v35  ;;  %v2986_v42 = vld [vmem:[#allocation5 + $0x3] ss:$0 sm:$0xff]  ;;  %v3484_v33 = vld [vmem:[%s4358_s4 + $0x2c] ss:$16 sps:$4 sm:$0xff]   ;;  %v3485_v35 = vld [vmem:[%s4359_s5] sm:$0xff]  }
0x1703   :  { %v2261_v57 = vsel %vm1071_vm4, %v3568_v15, 0.0 }
0x1704   :  { %2262 = vadd.xlane.f32.xlu0 %v2261_v57 }
0x171a   :  { %2316 = vrot.lane.b32.xlu0 %v4050_v43, %s3683_s19 }
0x171e   :  { %3458 = vrot.lane.b32.xlu0 %v3457_v36, %s3687_s0 }
0x1722   :  { %2414 = vrot.lane.b32.xlu0 %v3476_v21, %s3686_s24 }
0x1726   :  { %2479 = vrot.lane.b32.xlu0 %v3478_v25, %s3675_s29 }
0x178d   :  { %v2260_v38 = vpop.xlane.xlu0 %2259 }
0x178e   :  { %3569 = vrcp.f32 %v2260_v38 }
0x1791   :  { %v2263_v40 = vpop.xlane.xlu0 %2262 }
0x1792   :  { %3571 = vrcp.f32 %v2263_v40 }
0x1795   :  { %v2317_v16 = vpop.permute.xlu0 %2316 }
0x1796   :  { %3359 = vmatpush3.bf16.msra.mxu1 %v2317_v16 }
0x1797   :  { %3372 = vmatprep.subr.bf16.mxu1 %v3673_v0 }
0x1798   :  { %v3570_v17 = vpop.eup %3569 }
0x1799   :  { %v2266_v18 = vmul.f32 %v3570_v17, %v3566_v44  ;;  %v3459_v22 = vpop.permute.xlu0 %3458 }
0x179a   :  { %v3461_v36 = vunpack.i.h.bf16 %v3459_v22  ;;  %v3460_v37 = vunpack.i.l.bf16 %v3459_v22 }
0x179b   :  { %v2268_v19 = vpack.c.bf16 %v2266_v18, %v2266_v18 }
0x179c   :  { %v3572_v52 = vpop.eup %3571  ;;  %v2389_v48 = vsel %vm1071_vm4, %v2387_v41, %v3461_v36  ;;  %v2388_v3 = vsel %vm1071_vm4, %v2386_v45, %v3460_v37  ;;  %v3486_v36 = vld [vmem:[%s4359_s5 + $0x8] sm:$0xff]   ;;  %v3487_v37 = vld [vmem:[%s4359_s5 + $0x10] sm:$0xff]   ;;  %v3489_v41 = vld [vmem:[%s4359_s5 + $0x20] sm:$0xff]  }
0x179d   :  { %v2267_v7 = vmul.f32 %v3572_v52, %v3568_v15  ;;  %3355 = vmatmul.mubr.msk.bf16.vlgmr.msra.gmra.mrb[64].mxu0 %vm1071_vm4, %v2268_v19  ;;  %v2415_v23 = vpop.permute.xlu0 %2414  ;;  %v3490_v45 = vld [vmem:[%s4359_s5 + $0x28] sm:$0xff]  }
0x179e   :  { %3365 = vmatpush3.bf16.msra.mxu0 %v2413_v63  ;;  %3368 = vmatprep.mubr.msk.bf16.mxu0 %vm3674_vm0, %v3673_v0 }
0x179f   :  { %v2269_v43 = vpack.c.bf16 %v2267_v7, %v2267_v7  ;;  %3366 = vmatprep.subr.bf16.mxu0 %v3673_v0 }
0x17a1   :  { %3361 = vmatmul.mubr.msk.bf16.vlgmr.msra.gmra.mrb[80].mxu1 %vm1071_vm4, %v2269_v43  ;;  %v2480_v39 = vpop.permute.xlu0 %2479 }
0x17a2   :  { %3376 = vmatprep.mubr.msk.bf16.mxu1 %vm3674_vm0, %v3673_v0  ;;  %3367 = vmatpush3.bf16.msra.mxu0 %v2415_v23 }
0x17a3   :  { %3380 = vmatprep.subr.bf16.mxu0 %v3673_v0 }
0x1870   :  { %v2310_v24 = vpop.f32.mrb[64].mxu0 }
0x1871   :  { %v3356_v20 = vpop.f32.mrb[65].mxu0 }
0x1872   :  { %v2313_v28 = vpop.f32.mrb[66].mxu0 }
0x1873   :  { %v3357_v26 = vpop.f32.mrb[67].mxu0 }
0x1874   :  { %v2356_v4 = vpop.f32.mrb[80].mxu1 }
0x1875   :  { %v3462_v27 = vpack.i.bf16 %v2356_v4, %v2310_v24  ;;  %v3362_v5 = vpop.f32.mrb[81].mxu1 }
0x1876   :  { %v2359_v29 = vpop.f32.mrb[82].mxu1 }
0x1877   :  { %v3363_v30 = vpop.f32.mrb[83].mxu1  ;;  %3463 = vrot.lane.b32.xlu1 %v3462_v27, %s3688_s28 }
0x1878   :  { %v3481_v30 = vld [vmem:[%s4358_s4 + $0xc] ss:$16 sps:$4 sm:$0xff]  }
0x187b   :  { %2477 = vrot.lane.b32.xlu1 %v3477_v31, %s3675_s29 }
0x18e9   :  { %v3464_v14 = vpop.permute.xlu1 %3463 }
0x18ea   :  { %v3466_v46 = vunpack.i.h.bf16 %v3464_v14  ;;  %v3465_v47 = vunpack.i.l.bf16 %v3464_v14  ;;  %v3488_v14 = vld [vmem:[%s4359_s5 + $0x18] sm:$0xff]  }
0x18ec   :  { %v2391_v49 = vsel %vm1074_vm5, %v2389_v48, %v3466_v46  ;;  %v2390_v50 = vsel %vm1074_vm5, %v2388_v3, %v3465_v47 }
0x18ed   :  { %v2396_v51 = vpack.c.bf16 %v2391_v49, %v2390_v50  ;;  %v2478_v53 = vpop.permute.xlu1 %2477 }
0x18ee   :  { %3373 = vmatpush3.bf16.msra.mxu1 %v2478_v53 }
0x18ef   :  { %3369 = vmatmul.mubr.msk.bf16.vlgmr.msra.gmra.mrb[68].mxu0 %vm88_vm1, %v2396_v51  ;;  %3374 = vmatprep.subr.bf16.mxu1 %v3673_v0 }
0x18f0   :  { %3381 = vmatpush3.bf16.msra.mxu0 %v3477_v31  ;;  %3384 = vmatprep.mubr.msk.bf16.mxu0 %vm3674_vm0, %v3673_v0  ;;  %v3479_v31 = vld [vmem:[%s4358_s4 + $0x8] ss:$16 sps:$4 sm:$0xff]  }
0x18f1   :  { %3382 = vmatprep.subr.bf16.mxu0 %v3673_v0 }
0x18f2   :  { %3375 = vmatpush3.bf16.msra.mxu1 %v2480_v39 }
0x18f3   :  { %3388 = vmatprep.subr.bf16.mxu1 %v3673_v0 }
0x18f4   :  { %3383 = vmatpush3.bf16.msra.mxu0 %v3478_v25 }
0x18f5   :  { %3396 = vmatprep.subr.bf16.mxu0 %v3673_v0 }
0x18f7   :  { %3385 = vmatmul.mubr.msk.bf16.vlgmr.msra.gmra.mrb[72].mxu0 %vm88_vm1, %v4044_v34 }
0x18f8   :  { %3412 = vmatprep.mubr.msk.bf16.mxu0 %vm3674_vm0, %v3673_v0  ;;  %3397 = vmatpush3.bf16.msra.mxu0 %v3485_v35 }
0x18f9   :  { %3398 = vmatprep.subr.bf16.mxu0 %v3673_v0 }
0x18fc   :  { %3399 = vmatpush3.bf16.msra.mxu0 %v3486_v36 }
0x18fd   :  { %3400 = vmatprep.subr.bf16.mxu0 %v3673_v0 }
0x1900   :  { %3401 = vmatpush3.bf16.msra.mxu0 %v3487_v37 }
0x1901   :  { %3402 = vmatprep.subr.bf16.mxu0 %v3673_v0 }
0x1904   :  { %3403 = vmatpush3.bf16.msra.mxu0 %v3488_v14 }
0x1905   :  { %3404 = vmatprep.subr.bf16.mxu0 %v3673_v0 }
0x1908   :  { %3405 = vmatpush3.bf16.msra.mxu0 %v3489_v41 }
0x1909   :  { %3406 = vmatprep.subr.bf16.mxu0 %v3673_v0 }
0x190c   :  { %3407 = vmatpush3.bf16.msra.mxu0 %v3490_v45 }
0x190d   :  { %3408 = vmatprep.subr.bf16.mxu0 %v3673_v0 }
0x19c2   :  { %v2455_v55 = vpop.f32.mrb[68].mxu0 }
0x19c3   :  { %v3370_v56 = vpop.f32.mrb[69].mxu0  ;;  %v2456_v59 = vadd.f32 %v2986_v42, %v2455_v55 }
0x19c4   :  { %v2458_v58 = vpop.f32.mrb[70].mxu0 }
0x19c5   :  { %v2459_v62 = vadd.f32 %v2986_v42, %v2458_v58  ;;  %v3371_v54 = vpop.f32.mrb[71].mxu0 }
0x19c7   :  { %v2466_v2 = vpack.c.bf16 %v2459_v62, %v2456_v59 }
0x19c9   :  { %3377 = vmatmul.mubr.msk.bf16.vlgmr.msra.gmra.mrb[84].mxu1 %vm88_vm1, %v2466_v2 }
0x19ca   :  { %v2563_v6 = vpop.f32.mrb[72].mxu0  ;;  %3392 = vmatprep.mubr.msk.bf16.mxu1 %vm3674_vm0, %v3673_v0 }
0x19cb   :  { %v3386_v34 = vpop.f32.mrb[73].mxu0 }
0x19cc   :  { %v2566_v60 = vpop.f32.mrb[74].mxu0 }
0x19cd   :  { %v3387_v8 = vpop.f32.mrb[75].mxu0 }
0x1a9c   :  { %v2520_v9 = vpop.f32.mrb[84].mxu1 }
0x1a9d   :  { %v2564_v10 = vadd.f32 %v2563_v6, %v2520_v9  ;;  %v3378_v12 = vpop.f32.mrb[85].mxu1 }
0x1a9e   :  { %v2523_v44 = vpop.f32.mrb[86].mxu1  ;;  %v2997_v12 = vld [vmem:[#allocation5 + $0x9] ss:$0 sm:$0xff] }
0x1a9f   :  { %v2575_v13 = vadd.f32 %v3997_v11, %v2564_v10  ;;  %v2567_v15 = vadd.f32 %v2566_v60, %v2523_v44  ;;  %v3379_v57 = vpop.f32.mrb[87].mxu1 }
0x1aa1   :  { %v2995_v38 = vmul.f32 -1.442695, %v2575_v13  ;;  %v2576_v40 = vadd.f32 %v3997_v11, %v2567_v15 }
0x1aa3   :  { %3573 = vpow2.f32 %v2995_v38  ;;  %v2996_v16 = vmul.f32 -1.442695, %v2576_v40  ;;  %v2998_v38 = vld [vmem:[#allocation5 + $0xa] ss:$0 sm:$0xff] }
0x1aa5   :  { %3575 = vpow2.f32 %v2996_v16 }
0x1aad   :  { %v3574_v17 = vpop.eup %3573 }
0x1aae   :  { %v2583_v18 = vadd.f32 1.0, %v3574_v17 }
0x1aaf   :  { %v3576_v19 = vpop.eup %3575 }
0x1ab0   :  { %3577 = vrcp.f32 %v2583_v18  ;;  %v2584_v52 = vadd.f32 1.0, %v3576_v19  ;;  %v3491_v19 = vld [vmem:[%s4359_s5 + $0x30] sm:$0xff]  }
0x1ab1   :  { %3409 = vmatpush3.bf16.msra.mxu0 %v3491_v19 }
0x1ab2   :  { %3579 = vrcp.f32 %v2584_v52  ;;  %3410 = vmatprep.subr.bf16.mxu0 %v3673_v0  ;;  %v3492_v52 = vld [vmem:[%s4359_s5 + $0x38] sm:$0xff]   ;;  %s3689_s5 = smov [#allocation7]  }
0x1ab3   :  { %s2910_s19 = sshll.u32 %s3689_s5, 4  ;;  %s2911_s19 = int_to_ptr.vmem [resolvable:$true] %s2910_s19 }
0x1ab4   :  { %s3641_s20 = scalar_lea.vmem %s2911_s19, 256  ;;  %p3646_p3 = scmp.lt.s32.totalorder %s2911_s19, %s2911_s19 }
0x1ab5   :  { %3411 = vmatpush3.bf16.msra.mxu0 %v3492_v52  ;;  %p3642_p2 = scmp.ne.s32.totalorder %s2911_s19, %s3641_s20  ;;  %p3647_p4 = scmp.lt.s32.totalorder %s3641_s20, %s3641_s20 }
0x1ab7   :  { %p3648_p5 = por %p3647_p4, %p3646_p3 }
0x1ab9   :  { %p3649_p6 = pnand %p3648_p5, %p3642_p2 }
0x1aba   :  { %v3578_v63 = vpop.eup %3577 }
0x1abb   :  { %v2589_v7 = vmul.f32 %v3578_v63, %v2456_v59  ;;  %v2999_v63 = vld [vmem:[#allocation5 + $0x5] ss:$0 sm:$0xff] }
0x1abc   :  { %v3580_v43 = vpop.eup %3579 }
0x1abd   :  { %v2591_v21 = vadd.f32 %v2589_v7, %v4038_v61  ;;  %v2590_v22 = vmul.f32 %v3580_v43, %v2459_v62 }
0x1abf   :  { %v2595_v23 = vsel %vm88_vm1, %v2591_v21, 0.0  ;;  %v2592_v24 = vadd.f32 %v2590_v22, %v4040_v1 }
0x1ac0   :  { %2596 = vadd.xlane.f32.xlu1 %v2595_v23 }
0x1ac1   :  { %v2598_v11 = vsel %vm88_vm1, %v2592_v24, 0.0 }
0x1ac2   :  { %2599 = vadd.xlane.f32.xlu0 %v2598_v11 }
0x1b4d   :  { %v2597_v20 = vpop.xlane.xlu1 %2596 }
0x1b4e   :  { %v2601_v25 = vmul.f32 0.03125, %v2597_v20 }
0x1b4f   :  { %v2600_v28 = vpop.xlane.xlu0 %2599 }
0x1b50   :  { %v4272_v26 = vsub.f32 %v2591_v21, %v2601_v25  ;;  %v2602_v4 = vmul.f32 0.03125, %v2600_v28  ;;  %v3005_v28 = vld [vmem:[#allocation5 + $0x6] ss:$0 sm:$0xff] }
0x1b52   :  { %v4274_v27 = vsub.f32 %v2592_v24, %v2602_v4  ;;  %v2605_v61 = vmul.f32 %v4272_v26, %v4272_v26 }
0x1b54   :  { %v2607_v5 = vsel %vm88_vm1, %v2605_v61, 0.0  ;;  %v2606_v1 = vmul.f32 %v4274_v27, %v4274_v27 }
0x1b55   :  { %2608 = vadd.xlane.f32.xlu0 %v2607_v5 }
0x1b56   :  { %v2610_v29 = vsel %vm88_vm1, %v2606_v1, 0.0 }
0x1b57   :  { %2611 = vadd.xlane.f32.xlu1 %v2610_v29 }
0x1b68   :  { %2677 = vrot.lane.b32.xlu1 %v3481_v30, %s3676_s13 }
0x1b6b   :  { %2675 = vrot.lane.b32.xlu0 %v3479_v31, %s3676_s13 }
0x1b6c   :  { %2679 = vrot.lane.b32.xlu1 %v3482_v32, %s3676_s13 }
0x1b6f   :  { %2681 = vrot.lane.b32.xlu0 %v3484_v33, %s3676_s13 }
0x1be2   :  { %v2609_v46 = vpop.xlane.xlu0 %2608 }
0x1be3   :  { %v2613_v47 = vmul.f32 0.032258064, %v2609_v46 }
0x1be4   :  { %v2612_v48 = vpop.xlane.xlu1 %2611 }
0x1be5   :  { %3581 = vrsqrt.f32 %v2613_v47  ;;  %v2614_v3 = vmul.f32 0.032258064, %v2612_v48  ;;  %vm2617_vm11 = vcmp.eq.f32.partialorder %v2613_v47, inf  ;;  %v2620_v58 = vand.u32 2147483648, %v2613_v47 }
0x1be6   :  { %v2676_v49 = vpop.permute.xlu0 %2675  ;;  %vm2619_vm12 = vcmp.eq.f32.partialorder %v2613_v47, 0.0 }
0x1be7   :  { %3583 = vrsqrt.f32 %v2614_v3  ;;  %vm2624_vm13 = vcmp.eq.f32.partialorder %v2614_v3, inf  ;;  %v2627_v34 = vand.u32 2147483648, %v2614_v3  ;;  %vm2626_vm14 = vcmp.eq.f32.partialorder %v2614_v3, 0.0 }
0x1be8   :  { %v2678_v50 = vpop.permute.xlu1 %2677 }
0x1be9   :  { %v2684_v51 = vsel %vm2683_vm10, %v2676_v49, %v2678_v50 }
0x1bea   :  { %3389 = vmatpush3.bf16.msra.mxu1 %v2684_v51  ;;  %v2682_v53 = vpop.permute.xlu0 %2681 }
0x1beb   :  { %3390 = vmatprep.subr.bf16.mxu1 %v3673_v0 }
0x1bec   :  { %v2680_v39 = vpop.permute.xlu1 %2679 }
0x1bed   :  { %v2685_v42 = vsel %vm2683_vm10, %v2680_v39, %v2682_v53 }
0x1bee   :  { %3391 = vmatpush3.bf16.msra.mxu1 %v2685_v42 }
0x1bef   :  { %v3582_v55 = vpop.eup %3581 }
0x1bf0   :  { %v2616_v56 = vmul.f32 %v3582_v55, %v2613_v47 }
0x1bf1   :  { %v3584_v59 = vpop.eup %3583 }
0x1bf2   :  { %v2618_v62 = vsel %vm2617_vm11, %v2613_v47, %v2616_v56  ;;  %v2623_v2 = vmul.f32 %v3584_v59, %v2614_v3 }
0x1bf3   :  { %v2621_v54 = vsel %vm2619_vm12, %v2620_v58, %v2618_v62 }
0x1bf4   :  { %v2629_v6 = vadd.f32 1e-06, %v2621_v54  ;;  %v2625_v60 = vsel %vm2624_vm13, %v2614_v3, %v2623_v2 }
0x1bf5   :  { %v2628_v8 = vsel %vm2626_vm14, %v2627_v34, %v2625_v60  ;;  %v3014_v60 = vld [vmem:[#allocation5 + $0xb] ss:$0 sm:$0xff] }
0x1bf6   :  { %3585 = vrcp.f32 %v2629_v6  ;;  %v2630_v9 = vadd.f32 1e-06, %v2628_v8 }
0x1bf8   :  { %3587 = vrcp.f32 %v2630_v9  ;;  %v3015_v9 = vld [vmem:[#allocation5 + $0xc] ss:$0 sm:$0xff] }
0x1c00   :  { %v3586_v10 = vpop.eup %3585 }
0x1c01   :  { %v2635_v44 = vmul.f32 %v3586_v10, %v4272_v26 }
0x1c02   :  { %v3588_v13 = vpop.eup %3587 }
0x1c03   :  { %v2636_v15 = vmul.f32 %v3588_v13, %v4274_v27  ;;  %v2641_v57 = vmul.f32 %v2997_v12, %v2635_v44 }
0x1c05   :  { %v2642_v40 = vmul.f32 %v2997_v12, %v2636_v15  ;;  %v2647_v16 = vadd.f32 %v2998_v38, %v2641_v57 }
0x1c07   :  { %v2648_v17 = vadd.f32 %v2998_v38, %v2642_v40 }
0x1c09   :  { %v2653_v18 = vpack.c.bf16 %v2648_v17, %v2647_v16 }
0x1c0b   :  { %3393 = vmatmul.mubr.msk.bf16.vlgmr.msra.gmra.mrb[88].mxu1 %vm88_vm1, %v2653_v18 }
0x1cde   :  { %v2725_v7 = vpop.f32.mrb[88].mxu1 }
0x1cdf   :  { %v2726_v43 = vadd.f32 %v2999_v63, %v2725_v7  ;;  %v3394_v21 = vpop.f32.mrb[89].mxu1 }
0x1ce0   :  { %v2728_v22 = vpop.f32.mrb[90].mxu1 }
0x1ce1   :  { %v2729_v23 = vadd.f32 %v2999_v63, %v2728_v22  ;;  %v3395_v24 = vpop.f32.mrb[91].mxu1  ;;  %v2732_v11 = vmax.f32 %v2726_v43, 0.0 }
0x1ce3   :  { %v2733_v20 = vmax.f32 %v2729_v23, 0.0 }
0x1ce5   :  { %v2750_v25 = vpack.c.bf16 %v2733_v20, %v2732_v11 }
0x1ce7   :  { %3413 = vmatmul.mubr.bf16.vlgmr.msra.gmra.mrb[76].mxu0 %v2750_v25 }
0x1dba   :  { %v2838_v26 = vpop.f32.mrb[76].mxu0 }
0x1dbb   :  { %v2839_v4 = vadd.f32 %v3005_v28, %v2838_v26  ;;  %v3414_v0 = vpop.f32.mrb[77].mxu0 }
0x1dbc   :  { %v2841_v27 = vpop.f32.mrb[78].mxu0 }
0x1dbd   :  { %v2845_v61 = vadd.f32 %v2839_v4, %v2647_v16  ;;  %v2842_v5 = vadd.f32 %v3005_v28, %v2841_v27  ;;  %v3415_v1 = vpop.f32.mrb[79].mxu0 }
0x1dbf   :  { %v2849_v29 = vsel %vm88_vm1, %v2845_v61, 0.0  ;;  %v2846_v30 = vadd.f32 %v2842_v5, %v2648_v17 }
0x1dc0   :  { %2850 = vadd.xlane.f32.xlu1 %v2849_v29 }
0x1dc1   :  { %v2852_v31 = vsel %vm88_vm1, %v2846_v30, 0.0 }
0x1dc2   :  { %2853 = vadd.xlane.f32.xlu0 %v2852_v31 }
0x1e4d   :  { %v2851_v32 = vpop.xlane.xlu1 %2850 }
0x1e4e   :  { %v2855_v33 = vmul.f32 0.03125, %v2851_v32 }
0x1e4f   :  { %v2854_v35 = vpop.xlane.xlu0 %2853 }
0x1e50   :  { %v2857_v36 = vsub.f32 %v2845_v61, %v2855_v33  ;;  %v2856_v37 = vmul.f32 0.03125, %v2854_v35 }
0x1e52   :  { %v2858_v14 = vsub.f32 %v2846_v30, %v2856_v37  ;;  %v2859_v41 = vmul.f32 %v2857_v36, %v2857_v36 }
0x1e54   :  { %v2861_v45 = vsel %vm88_vm1, %v2859_v41, 0.0  ;;  %v2860_v46 = vmul.f32 %v2858_v14, %v2858_v14 }
0x1e55   :  { %2862 = vadd.xlane.f32.xlu0 %v2861_v45 }
0x1e56   :  { %v2864_v47 = vsel %vm88_vm1, %v2860_v46, 0.0 }
0x1e57   :  { %2865 = vadd.xlane.f32.xlu1 %v2864_v47 }
0x1ee2   :  { %v2863_v48 = vpop.xlane.xlu0 %2862 }
0x1ee3   :  { %v2867_v3 = vmul.f32 0.032258064, %v2863_v48 }
0x1ee4   :  { %v2866_v49 = vpop.xlane.xlu1 %2865 }
0x1ee5   :  { %3589 = vrsqrt.f32 %v2867_v3  ;;  %v2868_v50 = vmul.f32 0.032258064, %v2866_v49  ;;  %vm2871_vm15 = vcmp.eq.f32.partialorder %v2867_v3, inf  ;;  %v2874_v39 = vand.u32 2147483648, %v2867_v3 }
0x1ee6   :  { %vm2873_vm0 = vcmp.eq.f32.partialorder %v2867_v3, 0.0 }
0x1ee7   :  { %3591 = vrsqrt.f32 %v2868_v50  ;;  %vm2878_vm2 = vcmp.eq.f32.partialorder %v2868_v50, inf  ;;  %v2881_v62 = vand.u32 2147483648, %v2868_v50  ;;  %vm2880_vm3 = vcmp.eq.f32.partialorder %v2868_v50, 0.0 }
0x1eef   :  { %v3590_v51 = vpop.eup %3589 }
0x1ef0   :  { %v2870_v53 = vmul.f32 %v3590_v51, %v2867_v3 }
0x1ef1   :  { %v3592_v42 = vpop.eup %3591 }
0x1ef2   :  { %v2872_v55 = vsel %vm2871_vm15, %v2867_v3, %v2870_v53  ;;  %v2877_v58 = vmul.f32 %v3592_v42, %v2868_v50 }
0x1ef3   :  { %v2875_v56 = vsel %vm2873_vm0, %v2874_v39, %v2872_v55 }
0x1ef4   :  { %v2883_v59 = vadd.f32 1e-06, %v2875_v56  ;;  %v2879_v54 = vsel %vm2878_vm2, %v2868_v50, %v2877_v58 }
0x1ef5   :  { %v2882_v2 = vsel %vm2880_vm3, %v2881_v62, %v2879_v54 }
0x1ef6   :  { %3593 = vrcp.f32 %v2883_v59  ;;  %v2884_v6 = vadd.f32 1e-06, %v2882_v2 }
0x1ef8   :  { %3595 = vrcp.f32 %v2884_v6 }
0x1f00   :  { %v3594_v34 = vpop.eup %3593 }
0x1f01   :  { %v2889_v8 = vmul.f32 %v3594_v34, %v2857_v36 }
0x1f02   :  { %v3596_v10 = vpop.eup %3595 }
0x1f03   :  { %v2895_v12 = vmul.f32 %v3014_v60, %v2889_v8  ;;  %v2890_v44 = vmul.f32 %v3596_v10, %v2858_v14 }
0x1f05   :  { %v2901_v13 = vadd.f32 %v3015_v9, %v2895_v12  ;;  %v2896_v15 = vmul.f32 %v3014_v60, %v2890_v44 }
0x1f07   :  { %2903 = vst.msk [vmem:[#allocation7] sm:$0xff] %vm88_vm1, %v2901_v13  ;;  %v2902_v57 = vadd.f32 %v3015_v9, %v2896_v15 }
0x1f09   :  { %2904 = vst.msk [vmem:[#allocation7 + $0x8] sm:$0xff] %vm88_vm1, %v2902_v57 }
0x1f0a   :  { %3652 = shalt.err (!%p3649_p6)
}
0x1f0b   :  { %s3653_s0 = scalar_lea.hbm %s4361_s7, 256 }
0x1f0c   :  { %p3654_p7 = scmp.ne.s32.totalorder %s4361_s7, %s3653_s0  ;;  %p3657_p8 = scmp.lt.u32.totalorder %s3653_s0, %s4361_s7 }
0x1f0e   :  { %p3659_p9 = pnand %p3657_p8, %p3654_p7 }
0x1f10   :  { %3662 = shalt.err (!%p3659_p9)
}
0x1f11   :  { %2916 = dma.vmem_to_hbm [thread:$0]  %s2911_s19, 256, %s4361_s7, [#allocation4], %s3670_s11, %s3670_s11, %s3671_s12  }
0x1f12   :  { %3667 = dma.done.wait [#allocation4], 256  }
0x1f13   :  { %3668 = vsyncadd [#allocation4], 4294967040 }
0x1f14   :  { %2920 = vsyncpa [#allocation3], 1 }
0x1f15   :  { %2921 = vsyncpa [#allocation6], 1 }
0x1f16   :  { %2922 = vsyncpa [#allocation4], 1 }

</bundles_post_ra>
